<compile_context>
chip_gen: v5e
topology: v5e:2x2
jax: 0.10.0
libtpu: 0.0.40
codegen_flags: <defaults>
</compile_context>

<pallas_src>
import jax
import jax.numpy as jnp
from jax.experimental import pallas as pl
from jax.experimental.pallas import tpu as pltpu


D_IN, D_H1, D_H2, D_OUT = 768, 512, 256, 50
D_OUT_PAD = 128  # lane-dense padded output width (minimum for unmasked stores)


def _round_up(n, m):
    return ((n + m - 1) // m) * m


def mlp_kernel(x_ref, w1_ref, b1_ref, w2_ref, b2_ref, w3_ref, b3_ref, o_ref):
    # Fused 3-layer MLP: all three matmuls hit the MXU with bf16 operands and f32
    # accumulation; bias add + ReLU stay in f32 on the VPU.
    x = x_ref[...].astype(jnp.bfloat16)  # in-kernel cast: no extra HBM pass over x
    h1 = jnp.dot(x, w1_ref[...], preferred_element_type=jnp.float32) + b1_ref[...]
    h1 = jnp.maximum(h1, 0.0).astype(jnp.bfloat16)
    h2 = jnp.dot(h1, w2_ref[...], preferred_element_type=jnp.float32) + b2_ref[...]
    h2 = jnp.maximum(h2, 0.0).astype(jnp.bfloat16)
    out = jnp.dot(h2, w3_ref[...], preferred_element_type=jnp.float32) + b3_ref[...]
    o_ref[...] = out.astype(o_ref.dtype)


def pack_params(params):
    """One-time pre-packing (call once, outside the hot path):
    bf16 matmul operands; final projection padded 50 -> 128 output columns."""
    w1, b1, w2, b2, w3, b3 = params
    w3p = jnp.pad(w3, ((0, 0), (0, D_OUT_PAD - D_OUT)))
    b3p = jnp.pad(b3, ((0, 0), (0, D_OUT_PAD - D_OUT)))
    return (
        w1.astype(jnp.bfloat16), b1.astype(jnp.float32),
        w2.astype(jnp.bfloat16), b2.astype(jnp.float32),
        w3p.astype(jnp.bfloat16), b3p.astype(jnp.float32),
    )


def _pick_tm(B):
    # Tiny batches: one exact block (block_shape == full batch dim is always legal),
    # no wasted MXU rows, latency-optimized.
    if B <= 128:
        return B
    # Larger batches: keep >= 2 blocks so the parallel grid axis can shard across
    # both TensorCores on v7x; cap at 1024 rows (VMEM ~13 MiB, fits everywhere).
    return min(1024, _round_up((B + 1) // 2, 128))


@jax.jit
def evidence_extractor(x, packed_params):
    """x: (B, 768) float32. packed_params from pack_params(). Returns (B, 50) float32."""
    w1, b1, w2, b2, w3p, b3p = packed_params
    B = x.shape[0]
    tm = _pick_tm(B)
    n_blocks = pl.cdiv(B, tm)

    full = lambda i: (0, 0)  # weights/biases: same (single) block at every grid step

    flops = 2 * B * (D_IN * D_H1 + D_H1 * D_H2 + D_H2 * D_OUT_PAD)
    bytes_accessed = (
        x.size * x.dtype.itemsize
        + sum(int(p.size) * p.dtype.itemsize for p in (w1, b1, w2, b2, w3p, b3p))
        + B * D_OUT_PAD * 4
    )

    out_padded = pl.pallas_call(
        mlp_kernel,
        out_shape=jax.ShapeDtypeStruct((B, D_OUT_PAD), jnp.float32),
        grid_spec=pltpu.PrefetchScalarGridSpec(
            num_scalar_prefetch=0,
            grid=(n_blocks,),
            in_specs=[
                pl.BlockSpec((tm, D_IN), lambda i: (i, 0)),
                pl.BlockSpec((D_IN, D_H1), full),
                pl.BlockSpec((1, D_H1), full),
                pl.BlockSpec((D_H1, D_H2), full),
                pl.BlockSpec((1, D_H2), full),
                pl.BlockSpec((D_H2, D_OUT_PAD), full),
                pl.BlockSpec((1, D_OUT_PAD), full),
            ],
            out_specs=pl.BlockSpec((tm, D_OUT_PAD), lambda i: (i, 0)),
        ),
        compiler_params=pltpu.CompilerParams(
            dimension_semantics=("parallel",),
            vmem_limit_bytes=32 * 1024 * 1024,
        ),
        cost_estimate=pl.CostEstimate(
            flops=flops, transcendentals=0, bytes_accessed=bytes_accessed
        ),
    )(x, w1, b1, w2, b2, w3p, b3p)

    # TODO(synk): consumers could read the lane-dense (B, 128) buffer directly and
    # skip this slice pass; kept to honor the PyTorch (B, 50) output contract.
    return out_padded[:, :D_OUT]


def init_params(key):
    """Deterministic init mirroring nn.Linear default (uniform +/- 1/sqrt(fan_in)).
    Weights stored as (in_features, out_features): y = x @ W + b == PyTorch x @ W.T + b."""
    def linear(key, fan_in, fan_out):
        kw, kb = jax.random.split(key)
        bound = 1.0 / jnp.sqrt(fan_in)
        w = jax.random.uniform(kw, (fan_in, fan_out), jnp.float32, -bound, bound)
        b = jax.random.uniform(kb, (1, fan_out), jnp.float32, -bound, bound)
        return w, b

    k1, k2, k3 = jax.random.split(key, 3)
    w1, b1 = linear(k1, D_IN, D_H1)
    w2, b2 = linear(k2, D_H1, D_H2)
    w3, b3 = linear(k3, D_H2, D_OUT)
    return (w1, b1, w2, b2, w3, b3)


def reference(x, params):
    # Same bf16-operand / f32-accumulation recipe as the kernel, for a tight check.
    w1, b1, w2, b2, w3, b3 = params
    bf = jnp.bfloat16
    h1 = jnp.maximum(
        jnp.dot(x.astype(bf), w1.astype(bf), preferred_element_type=jnp.float32) + b1, 0.0
    )
    h2 = jnp.maximum(
        jnp.dot(h1.astype(bf), w2.astype(bf), preferred_element_type=jnp.float32) + b2, 0.0
    )
    return jnp.dot(h2.astype(bf), w3.astype(bf), preferred_element_type=jnp.float32) + b3


if __name__ == "__main__":
    key = jax.random.PRNGKey(0)
    kx, kp = jax.random.split(key)

    params = init_params(kp)
    packed = pack_params(params)  # one-time weight packing (bf16 + lane padding)

    # Primary small-shape check: B=16 (single exact block).
    B = 16
    x = jax.random.normal(kx, (B, D_IN), dtype=jnp.float32)
    out = jax.block_until_ready(evidence_extractor(x, packed))
    ref = reference(x, params)
    assert out.shape == (B, D_OUT)
    assert jnp.allclose(out, ref, atol=2e-2, rtol=2e-2), "mismatch vs JAX reference (B=16)"

    # Ragged-batch check: B not a multiple of 8 (block_shape == full batch dim).
    B2 = 10
    x2 = jax.random.normal(kx, (B2, D_IN), dtype=jnp.float32)
    out2 = jax.block_until_ready(evidence_extractor(x2, packed))
    ref2 = reference(x2, params)
    assert out2.shape == (B2, D_OUT)
    assert jnp.allclose(out2, ref2, atol=2e-2, rtol=2e-2), "mismatch vs JAX reference (B=10)"

    print("KERNEL_OK")
</pallas_src>

<mosaic_0001>
module attributes {stable_mosaic.version = 11 : i64} {
  func.func @mlp_kernel(%arg0: i32, %arg1: memref<16x768xf32, #tpu.memory_space<vmem>>, %arg2: memref<768x512xbf16, #tpu.memory_space<vmem>>, %arg3: memref<1x512xf32, #tpu.memory_space<vmem>>, %arg4: memref<512x256xbf16, #tpu.memory_space<vmem>>, %arg5: memref<1x256xf32, #tpu.memory_space<vmem>>, %arg6: memref<256x128xbf16, #tpu.memory_space<vmem>>, %arg7: memref<1x128xf32, #tpu.memory_space<vmem>>, %arg8: memref<16x128xf32, #tpu.memory_space<vmem>>) attributes {dimension_semantics = [#tpu.dimension_semantics<parallel>], iteration_bounds = array<i64: 1>, scalar_prefetch = 0 : i64, scratch_operands = 0 : i64, tpu.core_type = #tpu.core_type<tc>, window_params = [{transform_indices = @transform_0, window_bounds = array<i64: 16, 768>}, {pipeline_mode = #tpu.pipeline_mode<synchronous>, transform_indices = @transform_1, window_bounds = array<i64: 768, 512>}, {pipeline_mode = #tpu.pipeline_mode<synchronous>, transform_indices = @transform_2, window_bounds = array<i64: 1, 512>}, {pipeline_mode = #tpu.pipeline_mode<synchronous>, transform_indices = @transform_3, window_bounds = array<i64: 512, 256>}, {pipeline_mode = #tpu.pipeline_mode<synchronous>, transform_indices = @transform_4, window_bounds = array<i64: 1, 256>}, {pipeline_mode = #tpu.pipeline_mode<synchronous>, transform_indices = @transform_5, window_bounds = array<i64: 256, 128>}, {pipeline_mode = #tpu.pipeline_mode<synchronous>, transform_indices = @transform_6, window_bounds = array<i64: 1, 128>}, {transform_indices = @transform_7, window_bounds = array<i64: 16, 128>}]} {
    %c0 = arith.constant 0 : index
    %c0_0 = arith.constant 0 : index
    %0 = vector.load %arg1[%c0, %c0_0] : memref<16x768xf32, #tpu.memory_space<vmem>>, vector<16x768xf32>
    %1 = arith.truncf %0 : vector<16x768xf32> to vector<16x768xbf16>
    %c0_1 = arith.constant 0 : index
    %c0_2 = arith.constant 0 : index
    %2 = vector.load %arg2[%c0_1, %c0_2] : memref<768x512xbf16, #tpu.memory_space<vmem>>, vector<768x512xbf16>
    %cst = arith.constant dense<0.000000e+00> : vector<16x512xf32>
    %3 = tpu.matmul %1, %2, %cst {dimension_numbers = #tpu.dot_dimension_numbers<[1], [0], [0], [1], [0, 0, 1, 1], [], []>} : vector<16x768xbf16>, vector<768x512xbf16>, vector<16x512xf32> -> vector<16x512xf32>
    %c0_3 = arith.constant 0 : index
    %c0_4 = arith.constant 0 : index
    %4 = vector.load %arg3[%c0_3, %c0_4] : memref<1x512xf32, #tpu.memory_space<vmem>>, vector<1x512xf32>
    %5 = vector.broadcast %4 : vector<1x512xf32> to vector<16x512xf32>
    %6 = arith.addf %3, %5 : vector<16x512xf32>
    %cst_5 = arith.constant 0.000000e+00 : f32
    %7 = vector.broadcast %cst_5 : f32 to vector<16x512xf32>
    %8 = arith.maximumf %6, %7 : vector<16x512xf32>
    %9 = arith.truncf %8 : vector<16x512xf32> to vector<16x512xbf16>
    %c0_6 = arith.constant 0 : index
    %c0_7 = arith.constant 0 : index
    %10 = vector.load %arg4[%c0_6, %c0_7] : memref<512x256xbf16, #tpu.memory_space<vmem>>, vector<512x256xbf16>
    %cst_8 = arith.constant dense<0.000000e+00> : vector<16x256xf32>
    %11 = tpu.matmul %9, %10, %cst_8 {dimension_numbers = #tpu.dot_dimension_numbers<[1], [0], [0], [1], [0, 0, 1, 1], [], []>} : vector<16x512xbf16>, vector<512x256xbf16>, vector<16x256xf32> -> vector<16x256xf32>
    %c0_9 = arith.constant 0 : index
    %c0_10 = arith.constant 0 : index
    %12 = vector.load %arg5[%c0_9, %c0_10] : memref<1x256xf32, #tpu.memory_space<vmem>>, vector<1x256xf32>
    %13 = vector.broadcast %12 : vector<1x256xf32> to vector<16x256xf32>
    %14 = arith.addf %11, %13 : vector<16x256xf32>
    %cst_11 = arith.constant 0.000000e+00 : f32
    %15 = vector.broadcast %cst_11 : f32 to vector<16x256xf32>
    %16 = arith.maximumf %14, %15 : vector<16x256xf32>
    %17 = arith.truncf %16 : vector<16x256xf32> to vector<16x256xbf16>
    %c0_12 = arith.constant 0 : index
    %c0_13 = arith.constant 0 : index
    %18 = vector.load %arg6[%c0_12, %c0_13] : memref<256x128xbf16, #tpu.memory_space<vmem>>, vector<256x128xbf16>
    %cst_14 = arith.constant dense<0.000000e+00> : vector<16x128xf32>
    %19 = tpu.matmul %17, %18, %cst_14 {dimension_numbers = #tpu.dot_dimension_numbers<[1], [0], [0], [1], [0, 0, 1, 1], [], []>} : vector<16x256xbf16>, vector<256x128xbf16>, vector<16x128xf32> -> vector<16x128xf32>
    %c0_15 = arith.constant 0 : index
    %c0_16 = arith.constant 0 : index
    %20 = vector.load %arg7[%c0_15, %c0_16] : memref<1x128xf32, #tpu.memory_space<vmem>>, vector<1x128xf32>
    %21 = vector.broadcast %20 : vector<1x128xf32> to vector<16x128xf32>
    %22 = arith.addf %19, %21 : vector<16x128xf32>
    %c0_17 = arith.constant 0 : index
    %c0_18 = arith.constant 0 : index
    %23 = vector.load %arg8[%c0_17, %c0_18] : memref<16x128xf32, #tpu.memory_space<vmem>>, vector<16x128xf32>
    tpu.vector_store %arg8[%c0_17, %c0_18], %22 {strides = array<i32>} : memref<16x128xf32, #tpu.memory_space<vmem>>, vector<16x128xf32>,
    return
  }
  func.func @transform_0(%arg0: i32) -> (i32, i32) {
    %c0_i32 = arith.constant 0 : i32
    %c0_i32_0 = arith.constant 0 : i32
    return %arg0, %c0_i32 : i32, i32
  }
  func.func @transform_1(%arg0: i32) -> (i32, i32) {
    %c0_i32 = arith.constant 0 : i32
    %c0_i32_0 = arith.constant 0 : i32
    %c0_i32_1 = arith.constant 0 : i32
    return %c0_i32, %c0_i32_0 : i32, i32
  }
  func.func @transform_2(%arg0: i32) -> (i32, i32) {
    %c0_i32 = arith.constant 0 : i32
    %c0_i32_0 = arith.constant 0 : i32
    %c0_i32_1 = arith.constant 0 : i32
    return %c0_i32, %c0_i32_0 : i32, i32
  }
  func.func @transform_3(%arg0: i32) -> (i32, i32) {
    %c0_i32 = arith.constant 0 : i32
    %c0_i32_0 = arith.constant 0 : i32
    %c0_i32_1 = arith.constant 0 : i32
    return %c0_i32, %c0_i32_0 : i32, i32
  }
  func.func @transform_4(%arg0: i32) -> (i32, i32) {
    %c0_i32 = arith.constant 0 : i32
    %c0_i32_0 = arith.constant 0 : i32
    %c0_i32_1 = arith.constant 0 : i32
    return %c0_i32, %c0_i32_0 : i32, i32
  }
  func.func @transform_5(%arg0: i32) -> (i32, i32) {
    %c0_i32 = arith.constant 0 : i32
    %c0_i32_0 = arith.constant 0 : i32
    %c0_i32_1 = arith.constant 0 : i32
    return %c0_i32, %c0_i32_0 : i32, i32
  }
  func.func @transform_6(%arg0: i32) -> (i32, i32) {
    %c0_i32 = arith.constant 0 : i32
    %c0_i32_0 = arith.constant 0 : i32
    %c0_i32_1 = arith.constant 0 : i32
    return %c0_i32, %c0_i32_0 : i32, i32
  }
  func.func @transform_7(%arg0: i32) -> (i32, i32) {
    %c0_i32 = arith.constant 0 : i32
    %c0_i32_0 = arith.constant 0 : i32
    return %arg0, %c0_i32 : i32, i32
  }
}

</mosaic_0001>

<bundles_post_ra>
// kernel: evidence_extractor.1
= control target key start
LH: loop header
LB: loop body
LE: loop exit
PB: predicated region body
PF: predicated region fallthrough
CT: control target
= control target key end

     0   :  { %12 = vsyncpa [#allocation3], 0  ;;  %s3982_s0 = inlined_call_operand.hbm [shape: f32[16,768], index: 0, kind: input, shape index: {}]   ;;  %s3983_s1 = inlined_call_operand.hbm [shape: bf16[768,512], index: 1, kind: input, shape index: {}]   ;;  %s3984_s2 = inlined_call_operand.hbm [shape: f32[1,512], index: 2, kind: input, shape index: {}]   ;;  %s3985_s3 = inlined_call_operand.hbm [shape: bf16[512,256], index: 3, kind: input, shape index: {}]   ;;  %s3986_s4 = inlined_call_operand.vmem [shape: f32[1,256], index: 4, kind: input, shape index: {}]   ;;  %s3987_s5 = inlined_call_operand.hbm [shape: bf16[256,128], index: 5, kind: input, shape index: {}]   ;;  %s3988_s6 = inlined_call_operand.vmem [shape: f32[1,128], index: 6, kind: input, shape index: {}]   ;;  %s3989_s7 = inlined_call_operand.hbm [shape: f32[16,128], index: 7, kind: output, shape index: {}]  }
   0x1   :  { %13 = vsyncpa [#allocation6], 0 }
   0x2   :  { %14 = vsyncpa [#allocation9], 0  ;;  %s33_s26 = sshll.u32 %s3983_s1, 4  ;;  %s34_s26 = int_to_ptr.hbm [resolvable:$true] %s33_s26 }
   0x3   :  { %15 = vsyncpa [#allocation4], 0  ;;  %s3849_s27 = smov [#allocation5]   ;;  %s57_s8 = sshll.u32 %s3985_s3, 4  ;;  %s58_s8 = int_to_ptr.hbm [resolvable:$true] %s57_s8 }
   0x4   :  { %s35_s28 = sshll.u32 %s3849_s27, 4  ;;  %s3850_s9 = smov 256   ;;  %s36_s28 = int_to_ptr.vmem [resolvable:$true] %s35_s28 }
   0x5   :  { %s3851_s10 = smov 16   ;;  %s3852_s11 = smov [#allocation8]  }
   0x6   :  { %41 = dma.hbm_to_vmem [thread:$0]  %s34_s26, 24576, %s36_s28, [#allocation6], %s3850_s9, %s3850_s9, %s3851_s10  }
   0x7   :  { %s59_s12 = sshll.u32 %s3852_s11, 4  ;;  %s3853_s13 = smov 128   ;;  %s60_s12 = int_to_ptr.vmem [resolvable:$true] %s59_s12 }
   0x8   :  { %s3854_s14 = smov 8   ;;  %s20_s16 = sshll.u32 %s3982_s0, 4  ;;  %s21_s16 = int_to_ptr.hbm [resolvable:$true] %s20_s16 }
   0x9   :  { %65 = dma.hbm_to_vmem [thread:$0]  %s58_s8, 8192, %s60_s12, [#allocation9], %s3853_s13, %s3853_s13, %s3854_s14  }
   0xa   :  { %s3855_s17 = smov [#allocation2]   ;;  %s47_s20 = sshll.u32 %s3984_s2, 4  ;;  %s48_s20 = int_to_ptr.hbm [resolvable:$true] %s47_s20 }
   0xb   :  { %s22_s3 = sshll.u32 %s3855_s17, 4  ;;  %s3856_s21 = smov 768   ;;  %s23_s3 = int_to_ptr.vmem [resolvable:$true] %s22_s3 }
   0xc   :  { %s3857_s22 = smov 48   ;;  %s3858_s23 = smov [#allocation7]  }
   0xd   :  { %28 = dma.hbm_to_vmem [thread:$0]  %s21_s16, 1536, %s23_s3, [#allocation3], %s3856_s21, %s3856_s21, %s3857_s22  }
   0xe   :  { %s49_s24 = sshll.u32 %s3858_s23, 4  ;;  %s72_s27 = sshll.u32 %s3987_s5, 4  ;;  %s50_s24 = int_to_ptr.vmem [resolvable:$true] %s49_s24  ;;  %s73_s27 = int_to_ptr.hbm [resolvable:$true] %s72_s27 }
   0xf   :  { %52 = dma.hbm_to_vmem [thread:$0]  %s48_s20, 64, %s50_s24, [#allocation6]  }
  0x10   :  { %s3859_s0 = smov [#allocation10]   ;;  %s3860_s29 = smov 64  }
  0x11   :  { %s74_s28 = sshll.u32 %s3859_s0, 4  ;;  %s3861_s30 = smov 4   ;;  %s75_s28 = int_to_ptr.vmem [resolvable:$true] %s74_s28 }
  0x12   :  { %80 = dma.hbm_to_vmem [thread:$0]  %s73_s27, 2048, %s75_s28, [#allocation9], %s3860_s29, %s3860_s29, %s3861_s30  }
  0x13   :  { %3841 = dma.done.wait [#allocation3], 1536  }
  0x14   :  { %3842 = vsyncadd [#allocation3], 4294965760 }
  0x15   :  { %3843 = dma.done.wait [#allocation6], 24640  }
  0x16   :  { %3844 = vsyncadd [#allocation6], 4294942656 }
  0x17   :  { %3845 = dma.done.wait [#allocation9], 10240  }
  0x18   :  { %3846 = vsyncadd [#allocation9], 4294957056  ;;  %v2436_v0 = vld [vmem:[#allocation5 + $0xe0] sm:$0xf]  ;;  %v3440_v1 = vld [vmem:[#allocation5 + $0xec] sm:$0xf0] }
  0x19   :  { %v2564_v2 = vld [vmem:[#allocation5 + $0x1e0] sm:$0xf]  ;;  %v2437_v3 = vor.u32 %v3440_v1, %v2436_v0  ;;  %v3472_v4 = vld [vmem:[#allocation5 + $0x1ec] sm:$0xf0]  ;;  %s3862_s9 = smov [#allocation11]   ;;  %s2307_s1 = sshll.u32 %s3989_s7, 4  ;;  %s2308_s1 = int_to_ptr.hbm [resolvable:$true] %s2307_s1 }
  0x1a   :  { %v2692_v5 = vld [vmem:[#allocation5 + $0x2e0] sm:$0xf]  ;;  %v3504_v6 = vld [vmem:[#allocation5 + $0x2ec] sm:$0xf0]  ;;  %v2565_v7 = vor.u32 %v3472_v4, %v2564_v2  ;;  %s2305_s10 = sshll.u32 %s3862_s9, 4  ;;  %s2306_s10 = int_to_ptr.vmem [resolvable:$true] %s2305_s10 }
  0x1b   :  { %v2693_v8 = vor.u32 %v3504_v6, %v2692_v5  ;;  %v2820_v9 = vld [vmem:[#allocation5 + $0x3e0] sm:$0xf]  ;;  %v3536_v10 = vld [vmem:[#allocation5 + $0x3ec] sm:$0xf0]  ;;  %1283 = vmatpush.bf16.msra.mxu0 %v2437_v3 }
  0x1c   :  { %v2420_v11 = vld [vmem:[#allocation5 + $0xc0] sm:$0xf]  ;;  %v2821_v12 = vor.u32 %v3536_v10, %v2820_v9  ;;  %v3436_v13 = vld [vmem:[#allocation5 + $0xcc] sm:$0xf0]  ;;  %1297 = vmatpush.bf16.msra.mxu1 %v2565_v7 }
  0x1d   :  { %v2548_v14 = vld [vmem:[#allocation5 + $0x1c0] sm:$0xf]  ;;  %v3468_v15 = vld [vmem:[#allocation5 + $0x1cc] sm:$0xf0]  ;;  %1311 = vmatpush.bf16.msra.mxu2 %v2693_v8  ;;  %v2421_v16 = vor.u32 %v3436_v13, %v2420_v11 }
  0x1e   :  { %v2549_v17 = vor.u32 %v3468_v15, %v2548_v14  ;;  %v2676_v18 = vld [vmem:[#allocation5 + $0x2c0] sm:$0xf]  ;;  %v3500_v19 = vld [vmem:[#allocation5 + $0x2cc] sm:$0xf0]  ;;  %1325 = vmatpush.bf16.msra.mxu3 %v2821_v12 }
  0x1f   :  { %v2804_v20 = vld [vmem:[#allocation5 + $0x3c0] sm:$0xf]  ;;  %v2677_v21 = vor.u32 %v3500_v19, %v2676_v18  ;;  %v3532_v22 = vld [vmem:[#allocation5 + $0x3cc] sm:$0xf0]  ;;  %1284 = vmatpush.bf16.msra.mxu0 %v2421_v16 }
  0x20   :  { %v2404_v23 = vld [vmem:[#allocation5 + $0xa0] sm:$0xf]  ;;  %v3432_v24 = vld [vmem:[#allocation5 + $0xac] sm:$0xf0]  ;;  %v2805_v25 = vor.u32 %v3532_v22, %v2804_v20  ;;  %1298 = vmatpush.bf16.msra.mxu1 %v2549_v17 }
  0x21   :  { %v2532_v26 = vld [vmem:[#allocation5 + $0x1a0] sm:$0xf]  ;;  %v3464_v27 = vld [vmem:[#allocation5 + $0x1ac] sm:$0xf0]  ;;  %v2405_v29 = vor.u32 %v3432_v24, %v2404_v23  ;;  %1312 = vmatpush.bf16.msra.mxu2 %v2677_v21 }
  0x22   :  { %v2660_v28 = vld [vmem:[#allocation5 + $0x2a0] sm:$0xf]  ;;  %v3496_v30 = vld [vmem:[#allocation5 + $0x2ac] sm:$0xf0]  ;;  %v2533_v33 = vor.u32 %v3464_v27, %v2532_v26  ;;  %1326 = vmatpush.bf16.msra.mxu3 %v2805_v25 }
  0x23   :  { %v2788_v31 = vld [vmem:[#allocation5 + $0x3a0] sm:$0xf]  ;;  %v3528_v32 = vld [vmem:[#allocation5 + $0x3ac] sm:$0xf0]  ;;  %v2661_v34 = vor.u32 %v3496_v30, %v2660_v28  ;;  %1285 = vmatpush.bf16.msra.mxu0 %v2405_v29 }
  0x24   :  { %v2388_v35 = vld [vmem:[#allocation5 + $0x80] sm:$0xf]  ;;  %v3428_v36 = vld [vmem:[#allocation5 + $0x8c] sm:$0xf0]  ;;  %v2789_v38 = vor.u32 %v3528_v32, %v2788_v31  ;;  %1299 = vmatpush.bf16.msra.mxu1 %v2533_v33  ;;  %v3438_v33 = vld [vmem:[#allocation5 + $0xe4] sm:$0xf] }
  0x25   :  { %v2516_v37 = vld [vmem:[#allocation5 + $0x180] sm:$0xf]  ;;  %v3460_v39 = vld [vmem:[#allocation5 + $0x18c] sm:$0xf0]  ;;  %v2389_v44 = vor.u32 %v3428_v36, %v2388_v35  ;;  %1313 = vmatpush.bf16.msra.mxu2 %v2661_v34  ;;  %v2438_v34 = vld [vmem:[#allocation5 + $0xf0] sm:$0xf0] }
  0x26   :  { %v2644_v40 = vld [vmem:[#allocation5 + $0x280] sm:$0xf]  ;;  %v3492_v41 = vld [vmem:[#allocation5 + $0x28c] sm:$0xf0]  ;;  %v2517_v45 = vor.u32 %v3460_v39, %v2516_v37  ;;  %1327 = vmatpush.bf16.msra.mxu3 %v2789_v38  ;;  %v3470_v37 = vld [vmem:[#allocation5 + $0x1e4] sm:$0xf] }
  0x27   :  { %v2772_v42 = vld [vmem:[#allocation5 + $0x380] sm:$0xf]  ;;  %v3524_v43 = vld [vmem:[#allocation5 + $0x38c] sm:$0xf0]  ;;  %v2645_v46 = vor.u32 %v3492_v41, %v2644_v40  ;;  %1286 = vmatpush.bf16.msra.mxu0 %v2389_v44  ;;  %v2566_v38 = vld [vmem:[#allocation5 + $0x1f0] sm:$0xf0] }
  0x28   :  { %v2372_v47 = vld [vmem:[#allocation5 + $0x60] sm:$0xf]  ;;  %v3424_v48 = vld [vmem:[#allocation5 + $0x6c] sm:$0xf0]  ;;  %v2773_v50 = vor.u32 %v3524_v43, %v2772_v42  ;;  %1300 = vmatpush.bf16.msra.mxu1 %v2517_v45  ;;  %v2441_v43 = vor.u32 %v3438_v33, %v2438_v34  ;;  %v2374_v33 = vld [vmem:[#allocation5 + $0x70] sm:$0xf0] }
  0x29   :  { %v2500_v49 = vld [vmem:[#allocation5 + $0x160] sm:$0xf]  ;;  %v3456_v51 = vld [vmem:[#allocation5 + $0x16c] sm:$0xf0]  ;;  %v2373_v56 = vor.u32 %v3424_v48, %v2372_v47  ;;  %1314 = vmatpush.bf16.msra.mxu2 %v2645_v46  ;;  %v2569_v47 = vor.u32 %v3470_v37, %v2566_v38  ;;  %v3434_v48 = vld [vmem:[#allocation5 + $0xc4] sm:$0xf] }
  0x2a   :  { %v2628_v52 = vld [vmem:[#allocation5 + $0x260] sm:$0xf]  ;;  %v3488_v53 = vld [vmem:[#allocation5 + $0x26c] sm:$0xf0]  ;;  %v2501_v57 = vor.u32 %v3456_v51, %v2500_v49  ;;  %1328 = vmatpush.bf16.msra.mxu3 %v2773_v50  ;;  %v2422_v49 = vld [vmem:[#allocation5 + $0xd0] sm:$0xf0] }
  0x2b   :  { %v2756_v54 = vld [vmem:[#allocation5 + $0x360] sm:$0xf]  ;;  %v3520_v55 = vld [vmem:[#allocation5 + $0x36c] sm:$0xf0]  ;;  %v2629_v58 = vor.u32 %v3488_v53, %v2628_v52  ;;  %1287 = vmatpush.bf16.msra.mxu0 %v2373_v56  ;;  %v3466_v50 = vld [vmem:[#allocation5 + $0x1c4] sm:$0xf] }
  0x2c   :  { %v2356_v59 = vld [vmem:[#allocation5 + $0x40] sm:$0xf]  ;;  %v3420_v60 = vld [vmem:[#allocation5 + $0x4c] sm:$0xf0]  ;;  %v2757_v62 = vor.u32 %v3520_v55, %v2756_v54  ;;  %1301 = vmatpush.bf16.msra.mxu1 %v2501_v57  ;;  %v2550_v51 = vld [vmem:[#allocation5 + $0x1d0] sm:$0xf0] }
  0x2d   :  { %v2484_v61 = vld [vmem:[#allocation5 + $0x140] sm:$0xf]  ;;  %v3452_v63 = vld [vmem:[#allocation5 + $0x14c] sm:$0xf0]  ;;  %v2357_v4 = vor.u32 %v3420_v60, %v2356_v59  ;;  %1315 = vmatpush.bf16.msra.mxu2 %v2629_v58  ;;  %v2425_v59 = vor.u32 %v3434_v48, %v2422_v49  ;;  %v3454_v34 = vld [vmem:[#allocation5 + $0x164] sm:$0xf] }
  0x2e   :  { %v2612_v0 = vld [vmem:[#allocation5 + $0x240] sm:$0xf]  ;;  %v3484_v1 = vld [vmem:[#allocation5 + $0x24c] sm:$0xf0]  ;;  %v2485_v5 = vor.u32 %v3452_v63, %v2484_v61  ;;  %1329 = vmatpush.bf16.msra.mxu3 %v2757_v62  ;;  %v3430_v62 = vld [vmem:[#allocation5 + $0xa4] sm:$0xf]  ;;  %v2553_v63 = vor.u32 %v3466_v50, %v2550_v51 }
  0x2f   :  { %v2740_v2 = vld [vmem:[#allocation5 + $0x340] sm:$0xf]  ;;  %v3516_v3 = vld [vmem:[#allocation5 + $0x34c] sm:$0xf0]  ;;  %v2613_v6 = vor.u32 %v3484_v1, %v2612_v0  ;;  %1288 = vmatpush.bf16.msra.mxu0 %v2357_v4  ;;  %v2406_v0 = vld [vmem:[#allocation5 + $0xb0] sm:$0xf0] }
  0x30   :  { %v2340_v7 = vld [vmem:[#allocation5 + $0x20] sm:$0xf]  ;;  %v3416_v8 = vld [vmem:[#allocation5 + $0x2c] sm:$0xf0]  ;;  %v2741_v10 = vor.u32 %v3516_v3, %v2740_v2  ;;  %1302 = vmatpush.bf16.msra.mxu1 %v2485_v5  ;;  %v104_v1 = vld [vmem:[#allocation2 + $0x8] sm:$0xff] }
  0x31   :  { %v2468_v9 = vld [vmem:[#allocation5 + $0x120] sm:$0xf]  ;;  %v3448_v11 = vld [vmem:[#allocation5 + $0x12c] sm:$0xf0]  ;;  %v2341_v16 = vor.u32 %v3416_v8, %v2340_v7  ;;  %1316 = vmatpush.bf16.msra.mxu2 %v2613_v6  ;;  %v110_v2 = vld [vmem:[#allocation2 + $0x38] sm:$0xff] }
  0x32   :  { %v2596_v12 = vld [vmem:[#allocation5 + $0x220] sm:$0xf]  ;;  %v3480_v13 = vld [vmem:[#allocation5 + $0x22c] sm:$0xf0]  ;;  %v2469_v19 = vor.u32 %v3448_v11, %v2468_v9  ;;  %1330 = vmatpush.bf16.msra.mxu3 %v2741_v10  ;;  %v3462_v3 = vld [vmem:[#allocation5 + $0x1a4] sm:$0xf]  ;;  %v3924_v6 = vpack.c.bf16 %v110_v2, %v104_v1 }
  0x33   :  { %v2724_v14 = vld [vmem:[#allocation5 + $0x320] sm:$0xf]  ;;  %v3512_v15 = vld [vmem:[#allocation5 + $0x32c] sm:$0xf0]  ;;  %v2597_v20 = vor.u32 %v3480_v13, %v2596_v12  ;;  %1289 = vmatpush.bf16.msra.mxu0 %v2341_v16  ;;  %v2534_v4 = vld [vmem:[#allocation5 + $0x1b0] sm:$0xf0]  ;;  %v2409_v12 = vor.u32 %v3430_v62, %v2406_v0 }
  0x34   :  { %v2324_v17 = vld [vmem:[#allocation5] sm:$0xf]  ;;  %v3412_v18 = vld [vmem:[#allocation5 + $0xc] sm:$0xf0]  ;;  %v2725_v24 = vor.u32 %v3512_v15, %v2724_v14  ;;  %1303 = vmatpush.bf16.msra.mxu1 %v2469_v19  ;;  %v3426_v13 = vld [vmem:[#allocation5 + $0x84] sm:$0xf]  ;;  %v2537_v16 = vor.u32 %v3462_v3, %v2534_v4 }
  0x35   :  { %v2452_v21 = vld [vmem:[#allocation5 + $0x100] sm:$0xf]  ;;  %v3444_v22 = vld [vmem:[#allocation5 + $0x10c] sm:$0xf0]  ;;  %v2325_v31 = vor.u32 %v3412_v18, %v2324_v17  ;;  %1317 = vmatpush.bf16.msra.mxu2 %v2597_v20  ;;  %v2390_v14 = vld [vmem:[#allocation5 + $0x90] sm:$0xf0] }
  0x36   :  { %v2580_v23 = vld [vmem:[#allocation5 + $0x200] sm:$0xf]  ;;  %v3476_v25 = vld [vmem:[#allocation5 + $0x20c] sm:$0xf0]  ;;  %v2453_v35 = vor.u32 %v3444_v22, %v2452_v21  ;;  %1331 = vmatpush.bf16.msra.mxu3 %v2725_v24  ;;  %v106_v18 = vld [vmem:[#allocation2 + $0x18] sm:$0xff] }
  0x37   :  { %v2708_v26 = vld [vmem:[#allocation5 + $0x300] sm:$0xf]  ;;  %v3508_v27 = vld [vmem:[#allocation5 + $0x30c] sm:$0xf0]  ;;  %v2581_v36 = vor.u32 %v3476_v25, %v2580_v23  ;;  %1290 = vmatpush.bf16.msra.mxu0 %v2325_v31  ;;  %v112_v19 = vld [vmem:[#allocation2 + $0x48] sm:$0xff] }
  0x38   :  { %v2948_v28 = vld [vmem:[#allocation5 + $0x4e0] sm:$0xf]  ;;  %v3568_v29 = vld [vmem:[#allocation5 + $0x4ec] sm:$0xf0]  ;;  %v2709_v39 = vor.u32 %v3508_v27, %v2708_v26  ;;  %1304 = vmatpush.bf16.msra.mxu1 %v2453_v35  ;;  %v3458_v20 = vld [vmem:[#allocation5 + $0x184] sm:$0xf]  ;;  %v3929_v23 = vpack.c.bf16 %v112_v19, %v106_v18  ;;  %v2393_v26 = vor.u32 %v3426_v13, %v2390_v14 }
  0x39   :  { %v3076_v30 = vld [vmem:[#allocation5 + $0x5e0] sm:$0xf]  ;;  %v3600_v32 = vld [vmem:[#allocation5 + $0x5ec] sm:$0xf0]  ;;  %v2949_v40 = vor.u32 %v3568_v29, %v2948_v28  ;;  %1318 = vmatpush.bf16.msra.mxu2 %v2581_v36  ;;  %v2518_v21 = vld [vmem:[#allocation5 + $0x190] sm:$0xf0] }
  0x3a   :  { %v2932_v41 = vld [vmem:[#allocation5 + $0x4c0] sm:$0xf]  ;;  %v3077_v42 = vor.u32 %v3600_v32, %v3076_v30  ;;  %v3564_v44 = vld [vmem:[#allocation5 + $0x4cc] sm:$0xf0]  ;;  %1332 = vmatpush.bf16.msra.mxu3 %v2709_v39  ;;  %v2521_v30 = vor.u32 %v3458_v20, %v2518_v21  ;;  %v3422_v32 = vld [vmem:[#allocation5 + $0x64] sm:$0xf] }
  0x3b   :  { %v3060_v45 = vld [vmem:[#allocation5 + $0x5c0] sm:$0xf]  ;;  %v3596_v46 = vld [vmem:[#allocation5 + $0x5cc] sm:$0xf0]  ;;  %1339 = vmatpush.bf16.msrb.mxu0 %v2949_v40  ;;  %v2933_v54 = vor.u32 %v3564_v44, %v2932_v41  ;;  %1305 = vmatmul.bf16.vlgmr.msra.gmra.mxu1 %v3924_v6  ;;  %v2502_v35 = vld [vmem:[#allocation5 + $0x170] sm:$0xf0]  ;;  %v2377_v38 = vor.u32 %v3422_v32, %v2374_v33 }
  0x3c   :  { %v103_v52 = vld [vmem:[#allocation2] sm:$0xff]  ;;  %v109_v53 = vld [vmem:[#allocation2 + $0x30] sm:$0xff]  ;;  %1353 = vmatpush.bf16.msrb.mxu1 %v3077_v42  ;;  %v3061_v58 = vor.u32 %v3596_v46, %v3060_v45  ;;  %v2505_v42 = vor.u32 %v3454_v34, %v2502_v35 }
  0x3d   :  { %v2916_v55 = vld [vmem:[#allocation5 + $0x4a0] sm:$0xf]  ;;  %v3560_v56 = vld [vmem:[#allocation5 + $0x4ac] sm:$0xf0]  ;;  %v3921_v57 = vpack.c.bf16 %v109_v53, %v103_v52  ;;  %1367 = vmatpush.bf16.msrb.mxu2 %v2441_v43  ;;  %1333 = vmatmul.bf16.vlgmr.msra.gmra.mxu3 %v3929_v23  ;;  %v3418_v44 = vld [vmem:[#allocation5 + $0x44] sm:$0xf] }
  0x3e   :  { %v3044_v60 = vld [vmem:[#allocation5 + $0x5a0] sm:$0xf]  ;;  %v3592_v61 = vld [vmem:[#allocation5 + $0x5ac] sm:$0xf0]  ;;  %1381 = vmatpush.bf16.msrb.mxu3 %v2569_v47  ;;  %v2917_v7 = vor.u32 %v3560_v56, %v2916_v55  ;;  %v2358_v45 = vld [vmem:[#allocation5 + $0x50] sm:$0xf0] }
  0x3f   :  { %1291 = vmatmul.bf16.vlgmr.msra.gmra.mxu0 %v3921_v57  ;;  %v2900_v5 = vld [vmem:[#allocation5 + $0x480] sm:$0xf]  ;;  %v3556_v8 = vld [vmem:[#allocation5 + $0x48c] sm:$0xf0]  ;;  %v3045_v11 = vor.u32 %v3592_v61, %v3044_v60  ;;  %v3450_v46 = vld [vmem:[#allocation5 + $0x144] sm:$0xf]  ;;  %v2361_v50 = vor.u32 %v3418_v44, %v2358_v45 }
  0x40   :  { %1340 = vmatpush.bf16.msrb.mxu0 %v2933_v54  ;;  %v3028_v9 = vld [vmem:[#allocation5 + $0x580] sm:$0xf]  ;;  %v3588_v10 = vld [vmem:[#allocation5 + $0x58c] sm:$0xf0]  ;;  %1354 = vmatpush.bf16.msrb.mxu1 %v3061_v58  ;;  %v2901_v24 = vor.u32 %v3556_v8, %v2900_v5  ;;  %v2486_v47 = vld [vmem:[#allocation5 + $0x150] sm:$0xf0] }
  0x41   :  { %1368 = vmatpush.bf16.msrb.mxu2 %v2425_v59  ;;  %v105_v15 = vld [vmem:[#allocation2 + $0x10] sm:$0xff]  ;;  %v111_v17 = vld [vmem:[#allocation2 + $0x40] sm:$0xff]  ;;  %v3029_v25 = vor.u32 %v3588_v10, %v3028_v9  ;;  %v2489_v54 = vor.u32 %v3450_v46, %v2486_v47 }
  0x42   :  { %1382 = vmatpush.bf16.msrb.mxu3 %v2553_v63  ;;  %v3927_v22 = vpack.c.bf16 %v111_v17, %v105_v15  ;;  %v2884_v27 = vld [vmem:[#allocation5 + $0x460] sm:$0xf]  ;;  %v3552_v28 = vld [vmem:[#allocation5 + $0x46c] sm:$0xf0]  ;;  %v3414_v56 = vld [vmem:[#allocation5 + $0x24] sm:$0xf] }
  0x43   :  { %v3012_v29 = vld [vmem:[#allocation5 + $0x560] sm:$0xf]  ;;  %v3584_v31 = vld [vmem:[#allocation5 + $0x56c] sm:$0xf0]  ;;  %v2885_v36 = vor.u32 %v3552_v28, %v2884_v27  ;;  %v2342_v58 = vld [vmem:[#allocation5 + $0x30] sm:$0xf0] }
  0x44   :  { %1341 = vmatpush.bf16.msrb.mxu0 %v2917_v7  ;;  %1355 = vmatpush.bf16.msrb.mxu1 %v3045_v11  ;;  %v3013_v37 = vor.u32 %v3584_v31, %v3012_v29  ;;  %v2868_v39 = vld [vmem:[#allocation5 + $0x440] sm:$0xf]  ;;  %v3548_v40 = vld [vmem:[#allocation5 + $0x44c] sm:$0xf0]  ;;  %v3446_v59 = vld [vmem:[#allocation5 + $0x124] sm:$0xf]  ;;  %v2345_v2 = vor.u32 %v3414_v56, %v2342_v58 }
  0x45   :  { %1369 = vmatpush.bf16.msrb.mxu2 %v2409_v12  ;;  %v2996_v41 = vld [vmem:[#allocation5 + $0x540] sm:$0xf]  ;;  %v3580_v43 = vld [vmem:[#allocation5 + $0x54c] sm:$0xf0]  ;;  %v2869_v48 = vor.u32 %v3548_v40, %v2868_v39  ;;  %v2470_v60 = vld [vmem:[#allocation5 + $0x130] sm:$0xf0] }
  0x46   :  { %1383 = vmatpush.bf16.msrb.mxu3 %v2537_v16  ;;  %1319 = vmatmul.bf16.vlgmr.msra.gmra.mxu2 %v3927_v22  ;;  %v2997_v49 = vor.u32 %v3580_v43, %v2996_v41  ;;  %v2852_v51 = vld [vmem:[#allocation5 + $0x420] sm:$0xf]  ;;  %v3544_v52 = vld [vmem:[#allocation5 + $0x42c] sm:$0xf0]  ;;  %v3410_v4 = vld [vmem:[#allocation5 + $0x4] sm:$0xf]  ;;  %v2473_v7 = vor.u32 %v3446_v59, %v2470_v60 }
  0x47   :  { %v2980_v53 = vld [vmem:[#allocation5 + $0x520] sm:$0xf]  ;;  %v3576_v55 = vld [vmem:[#allocation5 + $0x52c] sm:$0xf0]  ;;  %v2853_v61 = vor.u32 %v3544_v52, %v2852_v51  ;;  %v2326_v5 = vld [vmem:[#allocation5 + $0x10] sm:$0xf0] }
  0x48   :  { %1342 = vmatpush.bf16.msrb.mxu0 %v2901_v24  ;;  %1356 = vmatpush.bf16.msrb.mxu1 %v3029_v25  ;;  %v2836_v62 = vld [vmem:[#allocation5 + $0x400] sm:$0xf]  ;;  %v3540_v63 = vld [vmem:[#allocation5 + $0x40c] sm:$0xf0]  ;;  %v2981_v1 = vor.u32 %v3576_v55, %v2980_v53  ;;  %v3442_v8 = vld [vmem:[#allocation5 + $0x104] sm:$0xf]  ;;  %v2329_v19 = vor.u32 %v3410_v4, %v2326_v5 }
  0x49   :  { %1370 = vmatpush.bf16.msrb.mxu2 %v2393_v26  ;;  %v2964_v0 = vld [vmem:[#allocation5 + $0x500] sm:$0xf]  ;;  %v3572_v3 = vld [vmem:[#allocation5 + $0x50c] sm:$0xf0]  ;;  %v2454_v9 = vld [vmem:[#allocation5 + $0x110] sm:$0xf0]  ;;  %v2837_v14 = vor.u32 %v3540_v63, %v2836_v62 }
  0x4a   :  { %1384 = vmatpush.bf16.msrb.mxu3 %v2521_v30  ;;  %v3502_v10 = vld [vmem:[#allocation5 + $0x2e4] sm:$0xf]  ;;  %v2694_v11 = vld [vmem:[#allocation5 + $0x2f0] sm:$0xf0]  ;;  %v2965_v18 = vor.u32 %v3572_v3, %v2964_v0  ;;  %v2457_v25 = vor.u32 %v3442_v8, %v2454_v9  ;;  %v108_v27 = vld [vmem:[#allocation2 + $0x28] sm:$0xff] }
  0x4b   :  { %v3534_v12 = vld [vmem:[#allocation5 + $0x3e4] sm:$0xf]  ;;  %v2822_v13 = vld [vmem:[#allocation5 + $0x3f0] sm:$0xf0]  ;;  %v2697_v26 = vor.u32 %v3502_v10, %v2694_v11  ;;  %v114_v28 = vld [vmem:[#allocation2 + $0x58] sm:$0xff] }
  0x4c   :  { %1343 = vmatpush.bf16.msrb.mxu0 %v2885_v36  ;;  %1357 = vmatpush.bf16.msrb.mxu1 %v3013_v37  ;;  %v3566_v15 = vld [vmem:[#allocation5 + $0x4e4] sm:$0xf]  ;;  %v2950_v16 = vld [vmem:[#allocation5 + $0x4f0] sm:$0xf0]  ;;  %v2825_v29 = vor.u32 %v3534_v12, %v2822_v13  ;;  %v3935_v39 = vpack.c.bf16 %v114_v28, %v108_v27 }
  0x4d   :  { %1371 = vmatpush.bf16.msrb.mxu2 %v2377_v38  ;;  %v3598_v17 = vld [vmem:[#allocation5 + $0x5e4] sm:$0xf]  ;;  %v3078_v20 = vld [vmem:[#allocation5 + $0x5f0] sm:$0xf0]  ;;  %v2953_v30 = vor.u32 %v3566_v15, %v2950_v16 }
  0x4e   :  { %1385 = vmatpush.bf16.msrb.mxu3 %v2505_v42  ;;  %v107_v21 = vld [vmem:[#allocation2 + $0x20] sm:$0xff]  ;;  %v113_v24 = vld [vmem:[#allocation2 + $0x50] sm:$0xff]  ;;  %v3081_v34 = vor.u32 %v3598_v17, %v3078_v20 }
  0x4f   :  { %v3498_v31 = vld [vmem:[#allocation5 + $0x2c4] sm:$0xf]  ;;  %v2678_v32 = vld [vmem:[#allocation5 + $0x2d0] sm:$0xf0]  ;;  %v3933_v35 = vpack.c.bf16 %v113_v24, %v107_v21 }
  0x50   :  { %1344 = vmatpush.bf16.msrb.mxu0 %v2869_v48  ;;  %1358 = vmatpush.bf16.msrb.mxu1 %v2997_v49  ;;  %v3530_v33 = vld [vmem:[#allocation5 + $0x3c4] sm:$0xf]  ;;  %v2806_v36 = vld [vmem:[#allocation5 + $0x3d0] sm:$0xf0]  ;;  %v2681_v42 = vor.u32 %v3498_v31, %v2678_v32 }
  0x51   :  { %1372 = vmatpush.bf16.msrb.mxu2 %v2361_v50  ;;  %v3562_v37 = vld [vmem:[#allocation5 + $0x4c4] sm:$0xf]  ;;  %v2934_v38 = vld [vmem:[#allocation5 + $0x4d0] sm:$0xf0]  ;;  %v2809_v43 = vor.u32 %v3530_v33, %v2806_v36 }
  0x52   :  { %1386 = vmatpush.bf16.msrb.mxu3 %v2489_v54  ;;  %v3594_v40 = vld [vmem:[#allocation5 + $0x5c4] sm:$0xf]  ;;  %v3062_v41 = vld [vmem:[#allocation5 + $0x5d0] sm:$0xf0]  ;;  %v2937_v44 = vor.u32 %v3562_v37, %v2934_v38 }
  0x53   :  { %v3494_v45 = vld [vmem:[#allocation5 + $0x2a4] sm:$0xf]  ;;  %v2662_v46 = vld [vmem:[#allocation5 + $0x2b0] sm:$0xf0]  ;;  %v3065_v48 = vor.u32 %v3594_v40, %v3062_v41 }
  0x54   :  { %1345 = vmatpush.bf16.msrb.mxu0 %v2853_v61  ;;  %1359 = vmatpush.bf16.msrb.mxu1 %v2981_v1  ;;  %v3526_v47 = vld [vmem:[#allocation5 + $0x3a4] sm:$0xf]  ;;  %v2790_v49 = vld [vmem:[#allocation5 + $0x3b0] sm:$0xf0]  ;;  %v2665_v54 = vor.u32 %v3494_v45, %v2662_v46 }
  0x55   :  { %1373 = vmatpush.bf16.msrb.mxu2 %v2345_v2  ;;  %v3558_v50 = vld [vmem:[#allocation5 + $0x4a4] sm:$0xf]  ;;  %v2918_v51 = vld [vmem:[#allocation5 + $0x4b0] sm:$0xf0]  ;;  %v2793_v55 = vor.u32 %v3526_v47, %v2790_v49 }
  0x56   :  { %1387 = vmatpush.bf16.msrb.mxu3 %v2473_v7  ;;  %v3590_v52 = vld [vmem:[#allocation5 + $0x5a4] sm:$0xf]  ;;  %v3046_v53 = vld [vmem:[#allocation5 + $0x5b0] sm:$0xf0]  ;;  %v2921_v56 = vor.u32 %v3558_v50, %v2918_v51 }
  0x57   :  { %v3490_v58 = vld [vmem:[#allocation5 + $0x284] sm:$0xf]  ;;  %v2646_v59 = vld [vmem:[#allocation5 + $0x290] sm:$0xf0]  ;;  %v3049_v61 = vor.u32 %v3590_v52, %v3046_v53 }
  0x58   :  { %1346 = vmatpush.bf16.msrb.mxu0 %v2837_v14  ;;  %1360 = vmatpush.bf16.msrb.mxu1 %v2965_v18  ;;  %v3522_v60 = vld [vmem:[#allocation5 + $0x384] sm:$0xf]  ;;  %v2774_v62 = vld [vmem:[#allocation5 + $0x390] sm:$0xf0]  ;;  %v2649_v3 = vor.u32 %v3490_v58, %v2646_v59  ;;  %v3441_v58 = vld [vmem:[#allocation5 + $0xf4] sm:$0xf0] }
  0x59   :  { %1374 = vmatpush.bf16.msrb.mxu2 %v2329_v19  ;;  %v3554_v63 = vld [vmem:[#allocation5 + $0x484] sm:$0xf]  ;;  %v2902_v0 = vld [vmem:[#allocation5 + $0x490] sm:$0xf0]  ;;  %v2777_v4 = vor.u32 %v3522_v60, %v2774_v62  ;;  %v2572_v59 = vld [vmem:[#allocation5 + $0x1e8] sm:$0xf] }
  0x5a   :  { %1388 = vmatpush.bf16.msrb.mxu3 %v2457_v25  ;;  %v3586_v1 = vld [vmem:[#allocation5 + $0x584] sm:$0xf]  ;;  %v3030_v2 = vld [vmem:[#allocation5 + $0x590] sm:$0xf0]  ;;  %v2905_v5 = vor.u32 %v3554_v63, %v2902_v0  ;;  %v2700_v62 = vld [vmem:[#allocation5 + $0x2e8] sm:$0xf] }
  0x5b   :  { %1347 = vmatmul.bf16.vlgmr.msrb.gmra.mxu0 %v3933_v35  ;;  %1361 = vmatmul.bf16.vlgmr.msrb.gmra.mxu1 %v3935_v39  ;;  %v3486_v7 = vld [vmem:[#allocation5 + $0x264] sm:$0xf]  ;;  %v2630_v8 = vld [vmem:[#allocation5 + $0x270] sm:$0xf0]  ;;  %v3033_v10 = vor.u32 %v3586_v1, %v3030_v2  ;;  %v3505_v63 = vld [vmem:[#allocation5 + $0x2f4] sm:$0xf0] }
  0x5c   :  { %1395 = vmatpush.bf16.msra.mxu0 %v2697_v26  ;;  %1409 = vmatpush.bf16.msra.mxu1 %v2825_v29  ;;  %v3518_v9 = vld [vmem:[#allocation5 + $0x364] sm:$0xf]  ;;  %v2758_v11 = vld [vmem:[#allocation5 + $0x370] sm:$0xf0]  ;;  %v2633_v16 = vor.u32 %v3486_v7, %v2630_v8  ;;  %v2828_v2 = vld [vmem:[#allocation5 + $0x3e8] sm:$0xf]  ;;  %v2701_v8 = vor.u32 %v3505_v63, %v2700_v62 }
  0x5d   :  { %1423 = vmatpush.bf16.msra.mxu2 %v2953_v30  ;;  %1389 = vmatmul.bf16.vlgmr.msrb.gmra.mxu3 %v3924_v6  ;;  %v3550_v12 = vld [vmem:[#allocation5 + $0x464] sm:$0xf]  ;;  %v2886_v13 = vld [vmem:[#allocation5 + $0x470] sm:$0xf0]  ;;  %v2761_v17 = vor.u32 %v3518_v9, %v2758_v11  ;;  %v2428_v9 = vld [vmem:[#allocation5 + $0xc8] sm:$0xf] }
  0x5e   :  { %1437 = vmatpush.bf16.msra.mxu3 %v3081_v34  ;;  %1375 = vmatmul.bf16.vlgmr.msrb.gmra.mxu2 %v3921_v57  ;;  %v3582_v14 = vld [vmem:[#allocation5 + $0x564] sm:$0xf]  ;;  %v3014_v15 = vld [vmem:[#allocation5 + $0x570] sm:$0xf0]  ;;  %v2889_v18 = vor.u32 %v3550_v12, %v2886_v13  ;;  %v2556_v11 = vld [vmem:[#allocation5 + $0x1c8] sm:$0xf] }
  0x5f   :  { %v3482_v19 = vld [vmem:[#allocation5 + $0x244] sm:$0xf]  ;;  %v2614_v20 = vld [vmem:[#allocation5 + $0x250] sm:$0xf0]  ;;  %v3017_v24 = vor.u32 %v3582_v14, %v3014_v15  ;;  %v3469_v13 = vld [vmem:[#allocation5 + $0x1d4] sm:$0xf0] }
  0x60   :  { %1396 = vmatpush.bf16.msra.mxu0 %v2681_v42  ;;  %1410 = vmatpush.bf16.msra.mxu1 %v2809_v43  ;;  %v3514_v21 = vld [vmem:[#allocation5 + $0x344] sm:$0xf]  ;;  %v2742_v25 = vld [vmem:[#allocation5 + $0x350] sm:$0xf0]  ;;  %v2617_v30 = vor.u32 %v3482_v19, %v2614_v20  ;;  %v2684_v14 = vld [vmem:[#allocation5 + $0x2c8] sm:$0xf]  ;;  %v2557_v19 = vor.u32 %v3469_v13, %v2556_v11 }
  0x61   :  { %1424 = vmatpush.bf16.msra.mxu2 %v2937_v44  ;;  %v3546_v26 = vld [vmem:[#allocation5 + $0x444] sm:$0xf]  ;;  %v2870_v27 = vld [vmem:[#allocation5 + $0x450] sm:$0xf0]  ;;  %v2745_v31 = vor.u32 %v3514_v21, %v2742_v25  ;;  %v3501_v15 = vld [vmem:[#allocation5 + $0x2d4] sm:$0xf0] }
  0x62   :  { %1438 = vmatpush.bf16.msra.mxu3 %v3065_v48  ;;  %v3578_v28 = vld [vmem:[#allocation5 + $0x544] sm:$0xf]  ;;  %v2998_v29 = vld [vmem:[#allocation5 + $0x550] sm:$0xf0]  ;;  %v2873_v32 = vor.u32 %v3546_v26, %v2870_v27  ;;  %v2685_v20 = vor.u32 %v3501_v15, %v2684_v14  ;;  %v2412_v21 = vld [vmem:[#allocation5 + $0xa8] sm:$0xf] }
  0x63   :  { %v3478_v33 = vld [vmem:[#allocation5 + $0x224] sm:$0xf]  ;;  %v2598_v34 = vld [vmem:[#allocation5 + $0x230] sm:$0xf0]  ;;  %v3001_v37 = vor.u32 %v3578_v28, %v2998_v29  ;;  %v2540_v25 = vld [vmem:[#allocation5 + $0x1a8] sm:$0xf] }
  0x64   :  { %1397 = vmatpush.bf16.msra.mxu0 %v2665_v54  ;;  %1411 = vmatpush.bf16.msra.mxu1 %v2793_v55  ;;  %v3510_v36 = vld [vmem:[#allocation5 + $0x324] sm:$0xf]  ;;  %v2726_v38 = vld [vmem:[#allocation5 + $0x330] sm:$0xf0]  ;;  %v2601_v44 = vor.u32 %v3478_v33, %v2598_v34  ;;  %v3465_v27 = vld [vmem:[#allocation5 + $0x1b4] sm:$0xf0] }
  0x65   :  { %1425 = vmatpush.bf16.msra.mxu2 %v2921_v56  ;;  %v3542_v40 = vld [vmem:[#allocation5 + $0x424] sm:$0xf]  ;;  %v2854_v41 = vld [vmem:[#allocation5 + $0x430] sm:$0xf0]  ;;  %v2729_v48 = vor.u32 %v3510_v36, %v2726_v38  ;;  %v2444_v56 = vld [vmem:[#allocation5 + $0xe8] sm:$0xf]  ;;  %v2541_v33 = vor.u32 %v3465_v27, %v2540_v25 }
  0x66   :  { %1439 = vmatpush.bf16.msra.mxu3 %v3049_v61  ;;  %v3574_v42 = vld [vmem:[#allocation5 + $0x524] sm:$0xf]  ;;  %v2982_v43 = vld [vmem:[#allocation5 + $0x530] sm:$0xf0]  ;;  %v2857_v49 = vor.u32 %v3542_v40, %v2854_v41  ;;  %v3473_v61 = vld [vmem:[#allocation5 + $0x1f4] sm:$0xf0] }
  0x67   :  { %v3474_v45 = vld [vmem:[#allocation5 + $0x204] sm:$0xf]  ;;  %v2582_v46 = vld [vmem:[#allocation5 + $0x210] sm:$0xf0]  ;;  %v2985_v53 = vor.u32 %v3574_v42, %v2982_v43  ;;  %v2573_v7 = vor.u32 %v3473_v61, %v2572_v59  ;;  %v2668_v28 = vld [vmem:[#allocation5 + $0x2a8] sm:$0xf] }
  0x68   :  { %1398 = vmatpush.bf16.msra.mxu0 %v2649_v3  ;;  %1412 = vmatpush.bf16.msra.mxu1 %v2777_v4  ;;  %v3506_v47 = vld [vmem:[#allocation5 + $0x304] sm:$0xf]  ;;  %v2710_v50 = vld [vmem:[#allocation5 + $0x310] sm:$0xf0]  ;;  %v2585_v60 = vor.u32 %v3474_v45, %v2582_v46  ;;  %v3537_v3 = vld [vmem:[#allocation5 + $0x3f4] sm:$0xf0] }
  0x69   :  { %1426 = vmatpush.bf16.msra.mxu2 %v2905_v5  ;;  %v3538_v51 = vld [vmem:[#allocation5 + $0x404] sm:$0xf]  ;;  %v2838_v52 = vld [vmem:[#allocation5 + $0x410] sm:$0xf0]  ;;  %v2713_v0 = vor.u32 %v3506_v47, %v2710_v50  ;;  %v2445_v5 = vor.u32 %v3441_v58, %v2444_v56  ;;  %v2829_v12 = vor.u32 %v3537_v3, %v2828_v2  ;;  %v3497_v29 = vld [vmem:[#allocation5 + $0x2b4] sm:$0xf0] }
  0x6a   :  { %1440 = vmatpush.bf16.msra.mxu3 %v3033_v10  ;;  %v3570_v54 = vld [vmem:[#allocation5 + $0x504] sm:$0xf]  ;;  %v2966_v55 = vld [vmem:[#allocation5 + $0x510] sm:$0xf0]  ;;  %v2841_v1 = vor.u32 %v3538_v51, %v2838_v52  ;;  %v3437_v10 = vld [vmem:[#allocation5 + $0xd4] sm:$0xf0]  ;;  %v2669_v34 = vor.u32 %v3497_v29, %v2668_v28 }
  0x6b   :  { %v2969_v4 = vor.u32 %v3570_v54, %v2966_v55  ;;  %v2396_v36 = vld [vmem:[#allocation5 + $0x88] sm:$0xf]  ;;  %v3461_v41 = vld [vmem:[#allocation5 + $0x194] sm:$0xf0] }
  0x6c   :  { %1399 = vmatpush.bf16.msra.mxu0 %v2633_v16  ;;  %1413 = vmatpush.bf16.msra.mxu1 %v2761_v17  ;;  %v2812_v16 = vld [vmem:[#allocation5 + $0x3c8] sm:$0xf]  ;;  %v3533_v17 = vld [vmem:[#allocation5 + $0x3d4] sm:$0xf0] }
  0x6d   :  { %1427 = vmatpush.bf16.msra.mxu2 %v2889_v18  ;;  %v2429_v18 = vor.u32 %v3437_v10, %v2428_v9  ;;  %v2813_v26 = vor.u32 %v3533_v17, %v2812_v16  ;;  %v2524_v38 = vld [vmem:[#allocation5 + $0x188] sm:$0xf]  ;;  %v3493_v43 = vld [vmem:[#allocation5 + $0x294] sm:$0xf0] }
  0x6e   :  { %1441 = vmatpush.bf16.msra.mxu3 %v3017_v24  ;;  %v3433_v24 = vld [vmem:[#allocation5 + $0xb4] sm:$0xf0]  ;;  %v2652_v42 = vld [vmem:[#allocation5 + $0x288] sm:$0xf]  ;;  %v2525_v47 = vor.u32 %v3461_v41, %v2524_v38  ;;  %v3439_v41 = vld [vmem:[#allocation5 + $0xec] sm:$0xf] }
  0x6f   :  { %v3525_v45 = vld [vmem:[#allocation5 + $0x394] sm:$0xf0]  ;;  %v2508_v51 = vld [vmem:[#allocation5 + $0x168] sm:$0xf] }
  0x70   :  { %1400 = vmatpush.bf16.msra.mxu0 %v2617_v30  ;;  %1414 = vmatpush.bf16.msra.mxu1 %v2745_v31  ;;  %v2796_v30 = vld [vmem:[#allocation5 + $0x3a8] sm:$0xf]  ;;  %v3529_v31 = vld [vmem:[#allocation5 + $0x3b4] sm:$0xf0] }
  0x71   :  { %1428 = vmatpush.bf16.msra.mxu2 %v2873_v32  ;;  %v2413_v32 = vor.u32 %v3433_v24, %v2412_v21  ;;  %v2797_v40 = vor.u32 %v3529_v31, %v2796_v30  ;;  %v3425_v50 = vld [vmem:[#allocation5 + $0x74] sm:$0xf0]  ;;  %v2636_v54 = vld [vmem:[#allocation5 + $0x268] sm:$0xf] }
  0x72   :  { %1442 = vmatpush.bf16.msra.mxu3 %v3001_v37  ;;  %v3429_v37 = vld [vmem:[#allocation5 + $0x94] sm:$0xf0]  ;;  %v2764_v56 = vld [vmem:[#allocation5 + $0x368] sm:$0xf] }
  0x73   :  { %v2397_v46 = vor.u32 %v3429_v37, %v2396_v36  ;;  %v3489_v55 = vld [vmem:[#allocation5 + $0x274] sm:$0xf0]  ;;  %v2364_v62 = vld [vmem:[#allocation5 + $0x48] sm:$0xf] }
  0x74   :  { %1401 = vmatpush.bf16.msra.mxu0 %v2601_v44  ;;  %1415 = vmatpush.bf16.msra.mxu1 %v2729_v48  ;;  %v2780_v44 = vld [vmem:[#allocation5 + $0x388] sm:$0xf]  ;;  %v2653_v48 = vor.u32 %v3493_v43, %v2652_v42  ;;  %v3521_v58 = vld [vmem:[#allocation5 + $0x374] sm:$0xf0]  ;;  %v2637_v61 = vor.u32 %v3489_v55, %v2636_v54  ;;  %v2446_v42 = vld [vmem:[#allocation5 + $0xf8] sm:$0xf0] }
  0x75   :  { %1429 = vmatpush.bf16.msra.mxu2 %v2857_v49  ;;  %v2380_v49 = vld [vmem:[#allocation5 + $0x68] sm:$0xf]  ;;  %v2781_v52 = vor.u32 %v3525_v45, %v2780_v44  ;;  %v3421_v63 = vld [vmem:[#allocation5 + $0x54] sm:$0xf0]  ;;  %v3471_v45 = vld [vmem:[#allocation5 + $0x1ec] sm:$0xf] }
  0x76   :  { %1443 = vmatpush.bf16.msra.mxu3 %v2985_v53  ;;  %v3457_v53 = vld [vmem:[#allocation5 + $0x174] sm:$0xf0]  ;;  %v2381_v59 = vor.u32 %v3425_v50, %v2380_v49  ;;  %v2620_v3 = vld [vmem:[#allocation5 + $0x248] sm:$0xf]  ;;  %v2449_v50 = vor.u32 %v3439_v41, %v2446_v42 }
  0x77   :  { %v3453_v2 = vld [vmem:[#allocation5 + $0x154] sm:$0xf0]  ;;  %v2348_v11 = vld [vmem:[#allocation5 + $0x28] sm:$0xf] }
  0x78   :  { %1402 = vmatpush.bf16.msra.mxu0 %v2585_v60  ;;  %1416 = vmatpush.bf16.msra.mxu1 %v2713_v0  ;;  %v2509_v60 = vor.u32 %v3457_v53, %v2508_v51  ;;  %v2492_v0 = vld [vmem:[#allocation5 + $0x148] sm:$0xf]  ;;  %v3449_v15 = vld [vmem:[#allocation5 + $0x134] sm:$0xf0] }
  0x79   :  { %1430 = vmatpush.bf16.msra.mxu2 %v2841_v1  ;;  %v2765_v1 = vor.u32 %v3521_v58, %v2764_v56  ;;  %v2493_v9 = vor.u32 %v3453_v2, %v2492_v0  ;;  %v2476_v13 = vld [vmem:[#allocation5 + $0x128] sm:$0xf]  ;;  %v3481_v17 = vld [vmem:[#allocation5 + $0x234] sm:$0xf0]  ;;  %v3435_v56 = vld [vmem:[#allocation5 + $0xcc] sm:$0xf] }
  0x7a   :  { %1444 = vmatpush.bf16.msra.mxu3 %v2969_v4  ;;  %v3485_v4 = vld [vmem:[#allocation5 + $0x254] sm:$0xf0]  ;;  %v2604_v16 = vld [vmem:[#allocation5 + $0x228] sm:$0xf]  ;;  %v2477_v25 = vor.u32 %v3449_v15, %v2476_v13  ;;  %v2430_v58 = vld [vmem:[#allocation5 + $0xd8] sm:$0xf0] }
  0x7b   :  { %1403 = vmatmul.bf16.vlgmr.msra.gmra.mxu0 %v3927_v22  ;;  %1417 = vmatmul.bf16.vlgmr.msra.gmra.mxu1 %v3929_v23  ;;  %v2621_v10 = vor.u32 %v3485_v4, %v2620_v3  ;;  %v2332_v21 = vld [vmem:[#allocation5 + $0x8] sm:$0xf]  ;;  %v3413_v24 = vld [vmem:[#allocation5 + $0x14] sm:$0xf0] }
  0x7c   :  { %1451 = vmatpush.bf16.msrb.mxu0 %v2445_v5  ;;  %1465 = vmatpush.bf16.msrb.mxu1 %v2573_v7  ;;  %v2748_v5 = vld [vmem:[#allocation5 + $0x348] sm:$0xf]  ;;  %v3517_v7 = vld [vmem:[#allocation5 + $0x354] sm:$0xf0]  ;;  %v2333_v38 = vor.u32 %v3413_v24, %v2332_v21  ;;  %v2526_v21 = vld [vmem:[#allocation5 + $0x198] sm:$0xf0] }
  0x7d   :  { %1479 = vmatpush.bf16.msrb.mxu2 %v2701_v8  ;;  %1445 = vmatmul.bf16.vlgmr.msra.gmra.mxu3 %v3935_v39  ;;  %v2365_v8 = vor.u32 %v3421_v63, %v2364_v62  ;;  %v2749_v14 = vor.u32 %v3517_v7, %v2748_v5  ;;  %v2460_v27 = vld [vmem:[#allocation5 + $0x108] sm:$0xf]  ;;  %v3445_v28 = vld [vmem:[#allocation5 + $0x114] sm:$0xf0]  ;;  %v2433_v63 = vor.u32 %v3435_v56, %v2430_v58  ;;  %v3431_v5 = vld [vmem:[#allocation5 + $0xac] sm:$0xf] }
  0x7e   :  { %1493 = vmatpush.bf16.msrb.mxu3 %v2829_v12  ;;  %1431 = vmatmul.bf16.vlgmr.msra.gmra.mxu2 %v3933_v35  ;;  %v3417_v12 = vld [vmem:[#allocation5 + $0x34] sm:$0xf0]  ;;  %v2588_v29 = vld [vmem:[#allocation5 + $0x208] sm:$0xf]  ;;  %v2461_v43 = vor.u32 %v3445_v28, %v2460_v27  ;;  %v2414_v7 = vld [vmem:[#allocation5 + $0xb8] sm:$0xf0] }
  0x7f   :  { %v3477_v31 = vld [vmem:[#allocation5 + $0x214] sm:$0xf0]  ;;  %v3084_v37 = vld [vmem:[#allocation5 + $0x5e8] sm:$0xf] }
  0x80   :  { %1452 = vmatpush.bf16.msrb.mxu0 %v2429_v18  ;;  %1466 = vmatpush.bf16.msrb.mxu1 %v2557_v19  ;;  %v2732_v18 = vld [vmem:[#allocation5 + $0x328] sm:$0xf]  ;;  %v3513_v19 = vld [vmem:[#allocation5 + $0x334] sm:$0xf0]  ;;  %v2589_v44 = vor.u32 %v3477_v31, %v2588_v29 }
  0x81   :  { %1480 = vmatpush.bf16.msrb.mxu2 %v2685_v20  ;;  %v2349_v20 = vor.u32 %v3417_v12, %v2348_v11  ;;  %v2733_v30 = vor.u32 %v3513_v19, %v2732_v18  ;;  %v3569_v36 = vld [vmem:[#allocation5 + $0x4f4] sm:$0xf0]  ;;  %v2940_v51 = vld [vmem:[#allocation5 + $0x4c8] sm:$0xf]  ;;  %v2417_v12 = vor.u32 %v3431_v5, %v2414_v7  ;;  %v3427_v18 = vld [vmem:[#allocation5 + $0x8c] sm:$0xf] }
  0x82   :  { %1494 = vmatpush.bf16.msrb.mxu3 %v2813_v26  ;;  %v2605_v26 = vor.u32 %v3481_v17, %v2604_v16  ;;  %v3068_v53 = vld [vmem:[#allocation5 + $0x5c8] sm:$0xf]  ;;  %v3597_v55 = vld [vmem:[#allocation5 + $0x5d4] sm:$0xf0]  ;;  %v2398_v19 = vld [vmem:[#allocation5 + $0x98] sm:$0xf0] }
  0x83   :  { %v3069_v62 = vor.u32 %v3597_v55, %v3068_v53  ;;  %v2924_v0 = vld [vmem:[#allocation5 + $0x4a8] sm:$0xf]  ;;  %v3593_v4 = vld [vmem:[#allocation5 + $0x5b4] sm:$0xf0]  ;;  %v3411_v7 = vld [vmem:[#allocation5 + $0xc] sm:$0xf] }
  0x84   :  { %1453 = vmatpush.bf16.msrb.mxu0 %v2413_v32  ;;  %1467 = vmatpush.bf16.msrb.mxu1 %v2541_v33  ;;  %v2716_v32 = vld [vmem:[#allocation5 + $0x308] sm:$0xf]  ;;  %v3509_v33 = vld [vmem:[#allocation5 + $0x314] sm:$0xf0] }
  0x85   :  { %1481 = vmatpush.bf16.msrb.mxu2 %v2669_v34  ;;  %v2956_v34 = vld [vmem:[#allocation5 + $0x4e8] sm:$0xf]  ;;  %v3589_v17 = vld [vmem:[#allocation5 + $0x594] sm:$0xf0] }
  0x86   :  { %1495 = vmatpush.bf16.msrb.mxu3 %v2797_v40  ;;  %v3601_v40 = vld [vmem:[#allocation5 + $0x5f4] sm:$0xf0]  ;;  %v3052_v2 = vld [vmem:[#allocation5 + $0x5a8] sm:$0xf] }
  0x87   :  { %v3085_v49 = vor.u32 %v3601_v40, %v3084_v37  ;;  %v3053_v11 = vor.u32 %v3593_v4, %v3052_v2  ;;  %v2908_v13 = vld [vmem:[#allocation5 + $0x488] sm:$0xf]  ;;  %v3553_v28 = vld [vmem:[#allocation5 + $0x474] sm:$0xf0] }
  0x88   :  { %1454 = vmatpush.bf16.msrb.mxu0 %v2397_v46  ;;  %1468 = vmatpush.bf16.msrb.mxu1 %v2525_v47  ;;  %v2574_v46 = vld [vmem:[#allocation5 + $0x1f8] sm:$0xf0]  ;;  %v2717_v47 = vor.u32 %v3509_v33, %v2716_v32  ;;  %v3036_v15 = vld [vmem:[#allocation5 + $0x588] sm:$0xf]  ;;  %v3585_v31 = vld [vmem:[#allocation5 + $0x574] sm:$0xf0] }
  0x89   :  { %1482 = vmatpush.bf16.msrb.mxu2 %v2653_v48  ;;  %v2957_v48 = vor.u32 %v3569_v36, %v2956_v34  ;;  %v2577_v54 = vor.u32 %v3471_v45, %v2574_v46  ;;  %v2892_v27 = vld [vmem:[#allocation5 + $0x468] sm:$0xf]  ;;  %v3423_v32 = vld [vmem:[#allocation5 + $0x6c] sm:$0xf]  ;;  %v2382_v33 = vld [vmem:[#allocation5 + $0x78] sm:$0xf0] }
  0x8a   :  { %1496 = vmatpush.bf16.msrb.mxu3 %v2781_v52  ;;  %v3565_v52 = vld [vmem:[#allocation5 + $0x4d4] sm:$0xf0]  ;;  %v3020_v29 = vld [vmem:[#allocation5 + $0x568] sm:$0xf]  ;;  %v3455_v34 = vld [vmem:[#allocation5 + $0x16c] sm:$0xf]  ;;  %v2893_v37 = vor.u32 %v3553_v28, %v2892_v27  ;;  %v2385_v40 = vor.u32 %v3423_v32, %v2382_v33 }
  0x8b   :  { %v2510_v36 = vld [vmem:[#allocation5 + $0x178] sm:$0xf0]  ;;  %v2876_v41 = vld [vmem:[#allocation5 + $0x448] sm:$0xf]  ;;  %v3549_v42 = vld [vmem:[#allocation5 + $0x454] sm:$0xf0] }
  0x8c   :  { %1455 = vmatpush.bf16.msrb.mxu0 %v2381_v59  ;;  %1469 = vmatpush.bf16.msrb.mxu1 %v2509_v60  ;;  %v3467_v59 = vld [vmem:[#allocation5 + $0x1cc] sm:$0xf]  ;;  %v2558_v60 = vld [vmem:[#allocation5 + $0x1d8] sm:$0xf0]  ;;  %v3581_v45 = vld [vmem:[#allocation5 + $0x554] sm:$0xf0] }
  0x8d   :  { %1483 = vmatpush.bf16.msrb.mxu2 %v2637_v61  ;;  %v2941_v61 = vor.u32 %v3565_v52, %v2940_v51  ;;  %v2561_v3 = vor.u32 %v3467_v59, %v2558_v60  ;;  %v3419_v46 = vld [vmem:[#allocation5 + $0x4c] sm:$0xf]  ;;  %v2860_v53 = vld [vmem:[#allocation5 + $0x428] sm:$0xf]  ;;  %v3577_v58 = vld [vmem:[#allocation5 + $0x534] sm:$0xf0] }
  0x8e   :  { %1497 = vmatpush.bf16.msrb.mxu3 %v2765_v1  ;;  %v3561_v1 = vld [vmem:[#allocation5 + $0x4b4] sm:$0xf0]  ;;  %v2988_v55 = vld [vmem:[#allocation5 + $0x528] sm:$0xf]  ;;  %v3415_v59 = vld [vmem:[#allocation5 + $0x2c] sm:$0xf] }
  0x8f   :  { %v2350_v60 = vld [vmem:[#allocation5 + $0x38] sm:$0xf0]  ;;  %v2989_v2 = vor.u32 %v3577_v58, %v2988_v55  ;;  %v2972_v4 = vld [vmem:[#allocation5 + $0x508] sm:$0xf]  ;;  %v3573_v5 = vld [vmem:[#allocation5 + $0x514] sm:$0xf0] }
  0x90   :  { %1456 = vmatpush.bf16.msrb.mxu0 %v2365_v8  ;;  %1470 = vmatpush.bf16.msrb.mxu1 %v2493_v9  ;;  %v3463_v8 = vld [vmem:[#allocation5 + $0x1ac] sm:$0xf]  ;;  %v2542_v9 = vld [vmem:[#allocation5 + $0x1b8] sm:$0xf0] }
  0x91   :  { %1484 = vmatpush.bf16.msrb.mxu2 %v2621_v10  ;;  %v2925_v10 = vor.u32 %v3561_v1, %v2924_v0  ;;  %v2545_v16 = vor.u32 %v3463_v8, %v2542_v9  ;;  %v2844_v0 = vld [vmem:[#allocation5 + $0x408] sm:$0xf]  ;;  %v3541_v1 = vld [vmem:[#allocation5 + $0x414] sm:$0xf0]  ;;  %v2334_v9 = vld [vmem:[#allocation5 + $0x18] sm:$0xf0] }
  0x92   :  { %1498 = vmatpush.bf16.msrb.mxu3 %v2749_v14  ;;  %v3557_v14 = vld [vmem:[#allocation5 + $0x494] sm:$0xf0]  ;;  %v2814_v33 = vld [vmem:[#allocation5 + $0x3d8] sm:$0xf0]  ;;  %v3491_v55 = vld [vmem:[#allocation5 + $0x28c] sm:$0xf] }
  0x93   :  { %v2909_v24 = vor.u32 %v3557_v14, %v2908_v13  ;;  %v2702_v13 = vld [vmem:[#allocation5 + $0x2f8] sm:$0xf0]  ;;  %v3535_v14 = vld [vmem:[#allocation5 + $0x3ec] sm:$0xf] }
  0x94   :  { %1457 = vmatpush.bf16.msrb.mxu0 %v2349_v20  ;;  %1471 = vmatpush.bf16.msrb.mxu1 %v2477_v25  ;;  %v3459_v20 = vld [vmem:[#allocation5 + $0x18c] sm:$0xf]  ;;  %v3037_v25 = vor.u32 %v3589_v17, %v3036_v15  ;;  %v2845_v15 = vor.u32 %v3541_v1, %v2844_v0 }
  0x95   :  { %1485 = vmatpush.bf16.msrb.mxu2 %v2605_v26  ;;  %v2401_v26 = vor.u32 %v3427_v18, %v2398_v19  ;;  %v3567_v17 = vld [vmem:[#allocation5 + $0x4ec] sm:$0xf]  ;;  %v2958_v18 = vld [vmem:[#allocation5 + $0x4f8] sm:$0xf0]  ;;  %v2973_v19 = vor.u32 %v3573_v5, %v2972_v4 }
  0x96   :  { %1499 = vmatpush.bf16.msrb.mxu3 %v2733_v30  ;;  %v2529_v30 = vor.u32 %v3459_v20, %v2526_v21  ;;  %v2337_v20 = vor.u32 %v3411_v7, %v2334_v9  ;;  %v3599_v21 = vld [vmem:[#allocation5 + $0x5ec] sm:$0xf]  ;;  %v2961_v28 = vor.u32 %v3567_v17, %v2958_v18  ;;  %v2766_v7 = vld [vmem:[#allocation5 + $0x378] sm:$0xf0] }
  0x97   :  { %v3523_v58 = vld [vmem:[#allocation5 + $0x38c] sm:$0xf]  ;;  %v2894_v9 = vld [vmem:[#allocation5 + $0x478] sm:$0xf0] }
  0x98   :  { %1458 = vmatpush.bf16.msrb.mxu0 %v2333_v38  ;;  %1472 = vmatpush.bf16.msrb.mxu1 %v2461_v43  ;;  %v3021_v38 = vor.u32 %v3585_v31, %v3020_v29  ;;  %v3004_v43 = vld [vmem:[#allocation5 + $0x548] sm:$0xf]  ;;  %v3499_v29 = vld [vmem:[#allocation5 + $0x2cc] sm:$0xf] }
  0x99   :  { %1486 = vmatpush.bf16.msrb.mxu2 %v2589_v44  ;;  %v2513_v44 = vor.u32 %v3455_v34, %v2510_v36  ;;  %v3005_v51 = vor.u32 %v3581_v45, %v3004_v43  ;;  %v3531_v31 = vld [vmem:[#allocation5 + $0x3cc] sm:$0xf]  ;;  %v2942_v36 = vld [vmem:[#allocation5 + $0x4d8] sm:$0xf0] }
  0x9a   :  { %1500 = vmatpush.bf16.msrb.mxu3 %v2717_v47  ;;  %v2366_v47 = vld [vmem:[#allocation5 + $0x58] sm:$0xf0]  ;;  %v3563_v34 = vld [vmem:[#allocation5 + $0x4cc] sm:$0xf] }
  0x9b   :  { %1459 = vmatmul.bf16.vlgmr.msrb.gmra.mxu0 %v3921_v57  ;;  %1473 = vmatmul.bf16.vlgmr.msrb.gmra.mxu1 %v3924_v6  ;;  %v2369_v52 = vor.u32 %v3419_v46, %v2366_v47  ;;  %v3495_v43 = vld [vmem:[#allocation5 + $0x2ac] sm:$0xf]  ;;  %v2798_v47 = vld [vmem:[#allocation5 + $0x3b8] sm:$0xf0] }
  0x9c   :  { %1507 = vmatpush.bf16.msra.mxu0 %v2957_v48  ;;  %1521 = vmatpush.bf16.msra.mxu1 %v3085_v49  ;;  %v3451_v48 = vld [vmem:[#allocation5 + $0x14c] sm:$0xf]  ;;  %v2494_v49 = vld [vmem:[#allocation5 + $0x158] sm:$0xf0] }
  0x9d   :  { %1535 = vmatpush.bf16.msra.mxu2 %v2449_v50  ;;  %1501 = vmatmul.bf16.vlgmr.msrb.gmra.mxu3 %v3929_v23  ;;  %v2877_v50 = vor.u32 %v3549_v42, %v2876_v41  ;;  %v2497_v56 = vor.u32 %v3451_v48, %v2494_v49  ;;  %v2817_v41 = vor.u32 %v3531_v31, %v2814_v33  ;;  %v3527_v45 = vld [vmem:[#allocation5 + $0x3ac] sm:$0xf]  ;;  %v2926_v49 = vld [vmem:[#allocation5 + $0x4b8] sm:$0xf0] }
  0x9e   :  { %1549 = vmatpush.bf16.msra.mxu3 %v2577_v54  ;;  %1487 = vmatmul.bf16.vlgmr.msrb.gmra.mxu2 %v3927_v22  ;;  %v3545_v54 = vld [vmem:[#allocation5 + $0x434] sm:$0xf0]  ;;  %v2945_v42 = vor.u32 %v3563_v34, %v2942_v36  ;;  %v3559_v48 = vld [vmem:[#allocation5 + $0x4ac] sm:$0xf]  ;;  %v2606_v31 = vld [vmem:[#allocation5 + $0x238] sm:$0xf0] }
  0x9f   :  { %v3519_v4 = vld [vmem:[#allocation5 + $0x36c] sm:$0xf]  ;;  %v2734_v34 = vld [vmem:[#allocation5 + $0x338] sm:$0xf0] }
  0xa0   :  { %1508 = vmatpush.bf16.msra.mxu0 %v2941_v61  ;;  %1522 = vmatpush.bf16.msra.mxu1 %v3069_v62  ;;  %v3447_v61 = vld [vmem:[#allocation5 + $0x12c] sm:$0xf]  ;;  %v2478_v62 = vld [vmem:[#allocation5 + $0x138] sm:$0xf0] }
  0xa1   :  { %1536 = vmatpush.bf16.msra.mxu2 %v2433_v63  ;;  %v2861_v63 = vor.u32 %v3545_v54, %v2860_v53  ;;  %v2481_v8 = vor.u32 %v3447_v61, %v2478_v62  ;;  %v2801_v53 = vor.u32 %v3527_v45, %v2798_v47  ;;  %v2929_v54 = vor.u32 %v3559_v48, %v2926_v49  ;;  %v3555_v61 = vld [vmem:[#allocation5 + $0x48c] sm:$0xf]  ;;  %v2910_v62 = vld [vmem:[#allocation5 + $0x498] sm:$0xf0] }
  0xa2   :  { %1550 = vmatpush.bf16.msra.mxu3 %v2561_v3  ;;  %v2353_v3 = vor.u32 %v3415_v59, %v2350_v60  ;;  %v2782_v60 = vld [vmem:[#allocation5 + $0x398] sm:$0xf0]  ;;  %v3515_v17 = vld [vmem:[#allocation5 + $0x34c] sm:$0xf] }
  0xa3   :  { %v2785_v1 = vor.u32 %v3523_v58, %v2782_v60  ;;  %v3543_v36 = vld [vmem:[#allocation5 + $0x42c] sm:$0xf]  ;;  %v2718_v48 = vld [vmem:[#allocation5 + $0x318] sm:$0xf0] }
  0xa4   :  { %1509 = vmatpush.bf16.msra.mxu0 %v2925_v10  ;;  %1523 = vmatpush.bf16.msra.mxu1 %v3053_v11  ;;  %v3443_v10 = vld [vmem:[#allocation5 + $0x10c] sm:$0xf]  ;;  %v2462_v11 = vld [vmem:[#allocation5 + $0x118] sm:$0xf0] }
  0xa5   :  { %1537 = vmatpush.bf16.msra.mxu2 %v2417_v12  ;;  %v3503_v12 = vld [vmem:[#allocation5 + $0x2ec] sm:$0xf]  ;;  %v3633_v60 = vld [vmem:[#allocation8 + $0xf4] sm:$0xf0] }
  0xa6   :  { %1551 = vmatpush.bf16.msra.mxu3 %v2545_v16  ;;  %v2830_v16 = vld [vmem:[#allocation5 + $0x3f8] sm:$0xf0]  ;;  %v3507_v47 = vld [vmem:[#allocation5 + $0x30c] sm:$0xf] }
  0xa7   :  { %v2833_v27 = vor.u32 %v3535_v14, %v2830_v16  ;;  %v2622_v16 = vld [vmem:[#allocation5 + $0x258] sm:$0xf0] }
  0xa8   :  { %1510 = vmatpush.bf16.msra.mxu0 %v2909_v24  ;;  %1524 = vmatpush.bf16.msra.mxu1 %v3037_v25  ;;  %v3086_v24 = vld [vmem:[#allocation5 + $0x5f8] sm:$0xf0]  ;;  %v2465_v25 = vor.u32 %v3443_v10, %v2462_v11  ;;  %v3583_v10 = vld [vmem:[#allocation5 + $0x56c] sm:$0xf] }
  0xa9   :  { %1538 = vmatpush.bf16.msra.mxu2 %v2401_v26  ;;  %v2705_v26 = vor.u32 %v3503_v12, %v2702_v13  ;;  %v3089_v32 = vor.u32 %v3599_v21, %v3086_v24  ;;  %v3022_v11 = vld [vmem:[#allocation5 + $0x578] sm:$0xf0]  ;;  %v2769_v13 = vor.u32 %v3519_v4, %v2766_v7  ;;  %v3579_v24 = vld [vmem:[#allocation5 + $0x54c] sm:$0xf]  ;;  %v3204_v7 = vld [vmem:[#allocation8 + $0xe0] sm:$0xf] }
  0xaa   :  { %1552 = vmatpush.bf16.msra.mxu3 %v2529_v30  ;;  %v2686_v30 = vld [vmem:[#allocation5 + $0x2d8] sm:$0xf0]  ;;  %v3025_v18 = vor.u32 %v3583_v10, %v3022_v11 }
  0xab   :  { %v2878_v21 = vld [vmem:[#allocation5 + $0x458] sm:$0xf0] }
  0xac   :  { %1511 = vmatpush.bf16.msra.mxu0 %v2893_v37  ;;  %1525 = vmatpush.bf16.msra.mxu1 %v3021_v38  ;;  %v3595_v37 = vld [vmem:[#allocation5 + $0x5cc] sm:$0xf]  ;;  %v3070_v38 = vld [vmem:[#allocation5 + $0x5d8] sm:$0xf0] }
  0xad   :  { %1539 = vmatpush.bf16.msra.mxu2 %v2385_v40  ;;  %v2689_v40 = vor.u32 %v3499_v29, %v2686_v30  ;;  %v3073_v46 = vor.u32 %v3595_v37, %v3070_v38  ;;  %v3479_v30 = vld [vmem:[#allocation5 + $0x22c] sm:$0xf]  ;;  %v2862_v37 = vld [vmem:[#allocation5 + $0x438] sm:$0xf0] }
  0xae   :  { %1553 = vmatpush.bf16.msra.mxu3 %v2513_v44  ;;  %v2670_v44 = vld [vmem:[#allocation5 + $0x2b8] sm:$0xf0]  ;;  %v2865_v45 = vor.u32 %v3543_v36, %v2862_v37 }
  0xaf   :  { %v3625_v36 = vld [vmem:[#allocation8 + $0xb4] sm:$0xf0] }
  0xb0   :  { %1512 = vmatpush.bf16.msra.mxu0 %v2877_v50  ;;  %1526 = vmatpush.bf16.msra.mxu1 %v3005_v51  ;;  %v3591_v50 = vld [vmem:[#allocation5 + $0x5ac] sm:$0xf]  ;;  %v3054_v51 = vld [vmem:[#allocation5 + $0x5b8] sm:$0xf0] }
  0xb1   :  { %1540 = vmatpush.bf16.msra.mxu2 %v2369_v52  ;;  %v2673_v52 = vor.u32 %v3495_v43, %v2670_v44  ;;  %v3057_v59 = vor.u32 %v3591_v50, %v3054_v51  ;;  %v3475_v43 = vld [vmem:[#allocation5 + $0x20c] sm:$0xf]  ;;  %v2846_v51 = vld [vmem:[#allocation5 + $0x418] sm:$0xf0] }
  0xb2   :  { %1554 = vmatpush.bf16.msra.mxu3 %v2497_v56  ;;  %v2654_v56 = vld [vmem:[#allocation5 + $0x298] sm:$0xf0]  ;;  %v3539_v50 = vld [vmem:[#allocation5 + $0x40c] sm:$0xf] }
  0xb3   :  { %v2657_v0 = vor.u32 %v3491_v55, %v2654_v56  ;;  %v3617_v55 = vld [vmem:[#allocation8 + $0x74] sm:$0xf0]  ;;  %v3955_v56 = vld [vmem:[#allocation7] sm:$0xf] }
  0xb4   :  { %1513 = vmatpush.bf16.msra.mxu0 %v2861_v63  ;;  %1527 = vmatpush.bf16.msra.mxu1 %v2989_v2  ;;  %v3587_v63 = vld [vmem:[#allocation5 + $0x58c] sm:$0xf] }
  0xb5   :  { %1541 = vmatpush.bf16.msra.mxu2 %v2353_v3  ;;  %v3487_v2 = vld [vmem:[#allocation5 + $0x26c] sm:$0xf]  ;;  %v2638_v3 = vld [vmem:[#allocation5 + $0x278] sm:$0xf0] }
  0xb6   :  { %1555 = vmatpush.bf16.msra.mxu3 %v2481_v8  ;;  %v3551_v8 = vld [vmem:[#allocation5 + $0x46c] sm:$0xf]  ;;  %v2641_v12 = vor.u32 %v3487_v2, %v2638_v3  ;;  %v3140_v2 = vld [vmem:[#allocation8 + $0x60] sm:$0xf] }
  0xb7   :  { %v2897_v14 = vor.u32 %v3551_v8, %v2894_v9  ;;  %v3615_v3 = vld [vmem:[#allocation8 + $0x64] sm:$0xf0] }
  0xb8   :  { %1514 = vmatpush.bf16.msra.mxu0 %v2845_v15  ;;  %1528 = vmatpush.bf16.msra.mxu1 %v2973_v19  ;;  %v3483_v15 = vld [vmem:[#allocation5 + $0x24c] sm:$0xf]  ;;  %v2750_v19 = vld [vmem:[#allocation5 + $0x358] sm:$0xf0]  ;;  %v3953_v38 = vpop.f32.mrf.mxu1  ;;  %v3141_v9 = vor.u32 %v3615_v3, %v3140_v2  ;;  %v3632_v2 = vld [vmem:[#allocation8 + $0xf4] sm:$0xf] }
  0xb9   :  { %1542 = vmatpush.bf16.msra.mxu2 %v2337_v20  ;;  %v3547_v20 = vld [vmem:[#allocation5 + $0x44c] sm:$0xf]  ;;  %v3214_v3 = vld [vmem:[#allocation8 + $0xf8] sm:$0xf0] }
  0xba   :  { %1556 = vmatpush.bf16.msra.mxu3 %v2465_v25  ;;  %v3006_v25 = vld [vmem:[#allocation5 + $0x558] sm:$0xf0]  ;;  %v3631_v8 = vld [vmem:[#allocation8 + $0xe4] sm:$0xf0] }
  0xbb   :  { %1515 = vmatmul.bf16.vlgmr.msra.gmra.mxu0 %v3933_v35  ;;  %1529 = vmatmul.bf16.vlgmr.msra.gmra.mxu1 %v3935_v39  ;;  %v3009_v33 = vor.u32 %v3579_v24, %v3006_v25 }
  0xbc   :  { %1563 = vmatpush.bf16.msrb.mxu0 %v2705_v26  ;;  %1577 = vmatpush.bf16.msrb.mxu1 %v2833_v27  ;;  %v2625_v26 = vor.u32 %v3483_v15, %v2622_v16  ;;  %v2753_v27 = vor.u32 %v3515_v17, %v2750_v19  ;;  %v1292_v29 = vpop.f32.mrf.mxu0  ;;  %v3205_v15 = vor.u32 %v3631_v8, %v3204_v7  ;;  %v3196_v16 = vld [vmem:[#allocation8 + $0xd0] sm:$0xf]  ;;  %v3629_v17 = vld [vmem:[#allocation8 + $0xd4] sm:$0xf0] }
  0xbd   :  { %1591 = vmatpush.bf16.msrb.mxu2 %v2961_v28  ;;  %1557 = vmatmul.bf16.vlgmr.msra.gmra.mxu3 %v3924_v6  ;;  %v2913_v6 = vor.u32 %v3555_v61, %v2910_v62  ;;  %v2881_v28 = vor.u32 %v3547_v20, %v2878_v21  ;;  %v2721_v61 = vor.u32 %v3507_v47, %v2718_v48  ;;  %v3124_v21 = vld [vmem:[#allocation8 + $0x40] sm:$0xf] }
  0xbe   :  { %1605 = vmatpush.bf16.msrb.mxu3 %v3089_v32  ;;  %1543 = vmatmul.bf16.vlgmr.msra.gmra.mxu2 %v3921_v57  ;;  %v3038_v57 = vld [vmem:[#allocation5 + $0x598] sm:$0xf0]  ;;  %v3511_v32 = vld [vmem:[#allocation5 + $0x32c] sm:$0xf]  ;;  %v2849_v62 = vor.u32 %v3539_v50, %v2846_v51  ;;  %v3197_v24 = vor.u32 %v3629_v17, %v3196_v16  ;;  %v3100_v50 = vld [vmem:[#allocation8 + $0x10] sm:$0xf] }
  0xbf   :  { %v3041_v5 = vor.u32 %v3587_v63, %v3038_v57  ;;  %v2737_v44 = vor.u32 %v3511_v32, %v2734_v34  ;;  %v3180_v34 = vld [vmem:[#allocation8 + $0xb0] sm:$0xf]  ;;  %v3605_v51 = vld [vmem:[#allocation8 + $0x14] sm:$0xf0]  ;;  %v3206_v16 = vld [vmem:[#allocation8 + $0xe8] sm:$0xf0] }
  0xc0   :  { %1564 = vmatpush.bf16.msrb.mxu0 %v2689_v40  ;;  %1578 = vmatpush.bf16.msrb.mxu1 %v2817_v41  ;;  %v3575_v40 = vld [vmem:[#allocation5 + $0x52c] sm:$0xf]  ;;  %v2990_v41 = vld [vmem:[#allocation5 + $0x538] sm:$0xf0]  ;;  %v1334_v10 = vpop.f32.mrf.mxu3 }
  0xc1   :  { %1592 = vmatpush.bf16.msrb.mxu2 %v2945_v42  ;;  %v2609_v42 = vor.u32 %v3479_v30, %v2606_v31  ;;  %v2993_v49 = vor.u32 %v3575_v40, %v2990_v41  ;;  %v3116_v31 = vld [vmem:[#allocation8 + $0x30] sm:$0xf]  ;;  %v3108_v41 = vld [vmem:[#allocation8 + $0x20] sm:$0xf] }
  0xc2   :  { %1606 = vmatpush.bf16.msrb.mxu3 %v3073_v46  ;;  %v2590_v46 = vld [vmem:[#allocation5 + $0x218] sm:$0xf0] }
  0xc3   :  { %v2593_v58 = vor.u32 %v3475_v43, %v2590_v46  ;;  %v3181_v43 = vor.u32 %v3625_v36, %v3180_v34  ;;  %v3260_v36 = vld [vmem:[#allocation8 + $0x150] sm:$0xf] }
  0xc4   :  { %1565 = vmatpush.bf16.msrb.mxu0 %v2673_v52  ;;  %1579 = vmatpush.bf16.msrb.mxu1 %v2801_v53  ;;  %v3571_v52 = vld [vmem:[#allocation5 + $0x50c] sm:$0xf]  ;;  %v2974_v53 = vld [vmem:[#allocation5 + $0x518] sm:$0xf0] }
  0xc5   :  { %1593 = vmatpush.bf16.msrb.mxu2 %v2929_v54  ;;  %v3148_v54 = vld [vmem:[#allocation8 + $0x70] sm:$0xf]  ;;  %v2977_v63 = vor.u32 %v3571_v52, %v2974_v53 }
  0xc6   :  { %1607 = vmatpush.bf16.msrb.mxu3 %v3057_v59  ;;  %v3212_v59 = vld [vmem:[#allocation8 + $0xf0] sm:$0xf]  ;;  %v3149_v57 = vor.u32 %v3617_v55, %v3148_v54  ;;  %v3621_v55 = vld [vmem:[#allocation8 + $0x94] sm:$0xf0] }
  0xc7   :  { %v3213_v4 = vor.u32 %v3633_v60, %v3212_v59  ;;  %v3164_v54 = vld [vmem:[#allocation8 + $0x90] sm:$0xf] }
  0xc8   :  { %1566 = vmatpush.bf16.msrb.mxu0 %v2657_v0  ;;  %1580 = vmatpush.bf16.msrb.mxu1 %v2785_v1  ;;  %v315_v1 = vperm.slane %v3955_v56, 0 }
  0xc9   :  { %1594 = vmatpush.bf16.msrb.mxu2 %v2913_v6  ;;  %v1320_v0 = vpop.f32.mrf.mxu2  ;;  %v1294_v6 = vpop.f32.mrf.mxu0 }
  0xca   :  { %1608 = vmatpush.bf16.msrb.mxu3 %v3041_v5  ;;  %v1308_v5 = vpop.f32.mrf.mxu1  ;;  %v1293_v11 = vadd.f32 %v1292_v29, %v315_v1 }
  0xcc   :  { %1567 = vmatpush.bf16.msrb.mxu0 %v2641_v12  ;;  %1581 = vmatpush.bf16.msrb.mxu1 %v2769_v13  ;;  %v1295_v12 = vadd.f32 %v1294_v6, %v315_v1  ;;  %v3132_v13 = vld [vmem:[#allocation8 + $0x50] sm:$0xf]  ;;  %v1307_v19 = vadd.f32 %v3953_v38, %v1293_v11  ;;  %v3156_v1 = vld [vmem:[#allocation8 + $0x80] sm:$0xf]  ;;  %v3619_v6 = vld [vmem:[#allocation8 + $0x84] sm:$0xf0] }
  0xcd   :  { %1595 = vmatpush.bf16.msrb.mxu2 %v2897_v14  ;;  %v3613_v14 = vld [vmem:[#allocation8 + $0x54] sm:$0xf0]  ;;  %v3157_v11 = vor.u32 %v3619_v6, %v3156_v1 }
  0xce   :  { %1609 = vmatpush.bf16.msrb.mxu3 %v3025_v18  ;;  %v3133_v18 = vor.u32 %v3613_v14, %v3132_v13  ;;  %v1309_v20 = vadd.f32 %v1308_v5, %v1295_v12  ;;  %v1321_v29 = vadd.f32 %v1320_v0, %v1307_v19  ;;  %v3150_v0 = vld [vmem:[#allocation8 + $0x78] sm:$0xf0]  ;;  %v3614_v12 = vld [vmem:[#allocation8 + $0x64] sm:$0xf]  ;;  %v3142_v13 = vld [vmem:[#allocation8 + $0x68] sm:$0xf0]  ;;  %v3217_v14 = vor.u32 %v3632_v2, %v3214_v3 }
  0xcf   :  { %v3145_v19 = vor.u32 %v3614_v12, %v3142_v13  ;;  %v3604_v2 = vld [vmem:[#allocation8 + $0x14] sm:$0xf]  ;;  %v3252_v3 = vld [vmem:[#allocation8 + $0x140] sm:$0xf]  ;;  %v3166_v13 = vld [vmem:[#allocation8 + $0x98] sm:$0xf0] }
  0xd0   :  { %1568 = vmatpush.bf16.msrb.mxu0 %v2625_v26  ;;  %1582 = vmatpush.bf16.msrb.mxu1 %v2753_v27  ;;  %v3188_v26 = vld [vmem:[#allocation8 + $0xc0] sm:$0xf]  ;;  %v3627_v27 = vld [vmem:[#allocation8 + $0xc4] sm:$0xf0]  ;;  %v1335_v38 = vadd.f32 %v1334_v10, %v1321_v29  ;;  %v3620_v12 = vld [vmem:[#allocation8 + $0x94] sm:$0xf] }
  0xd1   :  { %1596 = vmatpush.bf16.msrb.mxu2 %v2881_v28  ;;  %v1322_v25 = vpop.f32.mrf.mxu2  ;;  %v3189_v32 = vor.u32 %v3627_v27, %v3188_v26  ;;  %v3628_v26 = vld [vmem:[#allocation8 + $0xd4] sm:$0xf]  ;;  %v3198_v27 = vld [vmem:[#allocation8 + $0xd8] sm:$0xf0] }
  0xd2   :  { %1610 = vmatpush.bf16.msrb.mxu3 %v3009_v33  ;;  %v1323_v30 = vadd.f32 %v1322_v25, %v1309_v20  ;;  %v1336_v33 = vpop.f32.mrf.mxu3  ;;  %v3612_v20 = vld [vmem:[#allocation8 + $0x54] sm:$0xf]  ;;  %v3649_v25 = vld [vmem:[#allocation8 + $0x174] sm:$0xf0]  ;;  %v3201_v34 = vor.u32 %v3628_v26, %v3198_v27  ;;  %v3618_v26 = vld [vmem:[#allocation8 + $0x84] sm:$0xf] }
  0xd3   :  { %v3158_v27 = vld [vmem:[#allocation8 + $0x88] sm:$0xf0] }
  0xd4   :  { %1569 = vmatpush.bf16.msrb.mxu0 %v2609_v42  ;;  %1583 = vmatpush.bf16.msrb.mxu1 %v2737_v44  ;;  %v1337_v40 = vadd.f32 %v1336_v33, %v1323_v30  ;;  %v3607_v42 = vld [vmem:[#allocation8 + $0x24] sm:$0xf0]  ;;  %v3172_v44 = vld [vmem:[#allocation8 + $0xa0] sm:$0xf]  ;;  %v3126_v33 = vld [vmem:[#allocation8 + $0x48] sm:$0xf0] }
  0xd5   :  { %1597 = vmatpush.bf16.msrb.mxu2 %v2865_v45  ;;  %v3623_v45 = vld [vmem:[#allocation8 + $0xa4] sm:$0xf0]  ;;  %v3109_v47 = vor.u32 %v3607_v42, %v3108_v41  ;;  %v3190_v41 = vld [vmem:[#allocation8 + $0xc8] sm:$0xf0] }
  0xd6   :  { %1611 = vmatpush.bf16.msrb.mxu3 %v2993_v49  ;;  %v3173_v52 = vor.u32 %v3623_v45, %v3172_v44 }
  0xd8   :  { %1570 = vmatpush.bf16.msrb.mxu0 %v2593_v58  ;;  %1584 = vmatpush.bf16.msrb.mxu1 %v2721_v61  ;;  %v1348_v28 = vpop.f32.mrf.mxu0  ;;  %v3101_v58 = vor.u32 %v3605_v51, %v3100_v50  ;;  %v3092_v61 = vld [vmem:[#allocation8] sm:$0xf]  ;;  %v3624_v51 = vld [vmem:[#allocation8 + $0xb4] sm:$0xf] }
  0xd9   :  { %1598 = vmatpush.bf16.msrb.mxu2 %v2849_v62  ;;  %v1349_v48 = vadd.f32 %v1348_v28, %v1335_v38  ;;  %v3603_v62 = vld [vmem:[#allocation8 + $0x4] sm:$0xf0] }
  0xda   :  { %1612 = vmatpush.bf16.msrb.mxu3 %v2977_v63  ;;  %v3616_v63 = vld [vmem:[#allocation8 + $0x74] sm:$0xf] }
  0xdb   :  { %1571 = vmatmul.bf16.vlgmr.msrb.gmra.mxu0 %v3927_v22  ;;  %1585 = vmatmul.bf16.vlgmr.msrb.gmra.mxu1 %v3929_v23  ;;  %v3611_v22 = vld [vmem:[#allocation8 + $0x44] sm:$0xf0] }
  0xdc   :  { %2021 = vmatpush.bf16.msra.mxu0 %v3149_v57  ;;  %2035 = vmatpush.bf16.msra.mxu1 %v3213_v4  ;;  %v3125_v23 = vor.u32 %v3611_v22, %v3124_v21  ;;  %v3165_v57 = vor.u32 %v3621_v55, %v3164_v54  ;;  %v3093_v4 = vor.u32 %v3603_v62, %v3092_v61  ;;  %v3134_v21 = vld [vmem:[#allocation8 + $0x58] sm:$0xf0]  ;;  %v3606_v55 = vld [vmem:[#allocation8 + $0x24] sm:$0xf]  ;;  %v3174_v62 = vld [vmem:[#allocation8 + $0xa8] sm:$0xf0] }
  0xdd   :  { %1599 = vmatmul.bf16.vlgmr.msrb.gmra.mxu2 %v3933_v35  ;;  %1613 = vmatmul.bf16.vlgmr.msrb.gmra.mxu3 %v3935_v39  ;;  %v1362_v35 = vpop.f32.mrf.mxu1  ;;  %v3609_v39 = vld [vmem:[#allocation8 + $0x34] sm:$0xf0]  ;;  %v3137_v30 = vor.u32 %v3612_v20, %v3134_v21  ;;  %v3622_v61 = vld [vmem:[#allocation8 + $0xa4] sm:$0xf]  ;;  %v3639_v20 = vld [vmem:[#allocation8 + $0x124] sm:$0xf0] }
  0xde   :  { %v3117_v37 = vor.u32 %v3609_v39, %v3116_v31  ;;  %v1363_v59 = vadd.f32 %v1362_v35, %v1349_v48  ;;  %v3647_v35 = vld [vmem:[#allocation8 + $0x164] sm:$0xf0]  ;;  %v3610_v31 = vld [vmem:[#allocation8 + $0x44] sm:$0xf]  ;;  %v3118_v48 = vld [vmem:[#allocation8 + $0x38] sm:$0xf0] }
  0xdf   :  { %v3129_v44 = vor.u32 %v3610_v31, %v3126_v33  ;;  %v3602_v21 = vld [vmem:[#allocation8 + $0x4] sm:$0xf]  ;;  %v3161_v33 = vor.u32 %v3618_v26, %v3158_v27  ;;  %v3655_v26 = vld [vmem:[#allocation8 + $0x1a4] sm:$0xf0] }
  0xe0   :  { %2022 = vmatpush.bf16.msra.mxu0 %v3141_v9  ;;  %2036 = vmatpush.bf16.msra.mxu1 %v3205_v15  ;;  %v1350_v46 = vpop.f32.mrf.mxu0  ;;  %v1619_v7 = vmax.f32 %v1363_v59, 0.0  ;;  %v3153_v9 = vor.u32 %v3616_v63, %v3150_v0  ;;  %v1390_v10 = vpop.f32.mrf.mxu3  ;;  %v3630_v15 = vld [vmem:[#allocation8 + $0xe4] sm:$0xf] }
  0xe1   :  { %v1351_v49 = vadd.f32 %v1350_v46, %v1337_v40  ;;  %v1376_v5 = vpop.f32.mrf.mxu2  ;;  %v3209_v22 = vor.u32 %v3630_v15, %v3206_v16  ;;  %v3626_v40 = vld [vmem:[#allocation8 + $0xc4] sm:$0xf] }
  0xe4   :  { %2023 = vmatpush.bf16.msra.mxu0 %v3133_v18  ;;  %2037 = vmatpush.bf16.msra.mxu1 %v3197_v24  ;;  %v316_v18 = vperm.slane %v3955_v56, 1  ;;  %v3276_v24 = vld [vmem:[#allocation8 + $0x170] sm:$0xf] }
  0xe5   :  { %v1364_v53 = vpop.f32.mrf.mxu1  ;;  %v3277_v28 = vor.u32 %v3649_v25, %v3276_v24  ;;  %v3169_v24 = vor.u32 %v3620_v12, %v3166_v13  ;;  %v3308_v13 = vld [vmem:[#allocation8 + $0x1b0] sm:$0xf] }
  0xe6   :  { %v1365_v60 = vadd.f32 %v1364_v53, %v1351_v49  ;;  %v1377_v29 = vadd.f32 %v1376_v5, %v316_v18  ;;  %v3193_v49 = vor.u32 %v3626_v40, %v3190_v41  ;;  %v3102_v5 = vld [vmem:[#allocation8 + $0x18] sm:$0xf0]  ;;  %v3220_v41 = vld [vmem:[#allocation8 + $0x100] sm:$0xf] }
  0xe7   :  { %2049 = vmatpush.bf16.msra.mxu2 %v3277_v28 }
  0xe8   :  { %2024 = vmatpush.bf16.msra.mxu0 %v3125_v23  ;;  %2038 = vmatpush.bf16.msra.mxu1 %v3189_v32  ;;  %v1623_v8 = vmax.f32 %v1365_v60, 0.0  ;;  %v3268_v23 = vld [vmem:[#allocation8 + $0x160] sm:$0xf]  ;;  %v1392_v38 = vpop.f32.mrf.mxu3  ;;  %v1391_v42 = vadd.f32 %v1390_v10, %v1377_v29  ;;  %v3641_v10 = vld [vmem:[#allocation8 + $0x134] sm:$0xf0] }
  0xe9   :  { %v3269_v39 = vor.u32 %v3647_v35, %v3268_v23  ;;  %v1378_v32 = vpop.f32.mrf.mxu2 }
  0xea   :  { %v3963_v17 = vpack.c.bf16 %v1623_v8, %v1619_v7  ;;  %v1379_v50 = vadd.f32 %v1378_v32, %v316_v18  ;;  %v3177_v7 = vor.u32 %v3622_v61, %v3174_v62  ;;  %v3105_v18 = vor.u32 %v3604_v2, %v3102_v5  ;;  %v3637_v32 = vld [vmem:[#allocation8 + $0x114] sm:$0xf0]  ;;  %v3642_v62 = vld [vmem:[#allocation8 + $0x144] sm:$0xf]  ;;  %v3316_v5 = vld [vmem:[#allocation8 + $0x1c0] sm:$0xf] }
  0xeb   :  { %2050 = vmatpush.bf16.msra.mxu2 %v3269_v39  ;;  %v3228_v39 = vld [vmem:[#allocation8 + $0x110] sm:$0xf] }
  0xec   :  { %2025 = vmatpush.bf16.msra.mxu0 %v3117_v37  ;;  %2039 = vmatpush.bf16.msra.mxu1 %v3181_v43  ;;  %v3645_v37 = vld [vmem:[#allocation8 + $0x154] sm:$0xf0]  ;;  %v1393_v60 = vadd.f32 %v1392_v38, %v1379_v50  ;;  %v3340_v50 = vld [vmem:[#allocation8 + $0x1f0] sm:$0xf] }
  0xed   :  { %v3261_v45 = vor.u32 %v3645_v37, %v3260_v36  ;;  %v3229_v36 = vor.u32 %v3637_v32, %v3228_v39  ;;  %v3222_v39 = vld [vmem:[#allocation8 + $0x108] sm:$0xf0] }
  0xef   :  { %2051 = vmatpush.bf16.msra.mxu2 %v3261_v45  ;;  %v3278_v45 = vld [vmem:[#allocation8 + $0x178] sm:$0xf0] }
  0xf0   :  { %2026 = vmatpush.bf16.msra.mxu0 %v3109_v47  ;;  %2040 = vmatpush.bf16.msra.mxu1 %v3173_v52  ;;  %v3608_v47 = vld [vmem:[#allocation8 + $0x34] sm:$0xf]  ;;  %v3182_v52 = vld [vmem:[#allocation8 + $0xb8] sm:$0xf0] }
  0xf1   :  { %v3121_v54 = vor.u32 %v3608_v47, %v3118_v48  ;;  %v3185_v59 = vor.u32 %v3624_v51, %v3182_v52  ;;  %v3646_v47 = vld [vmem:[#allocation8 + $0x164] sm:$0xf]  ;;  %v3270_v48 = vld [vmem:[#allocation8 + $0x168] sm:$0xf0]  ;;  %v3665_v51 = vld [vmem:[#allocation8 + $0x1f4] sm:$0xf0] }
  0xf2   :  { %v3341_v52 = vor.u32 %v3665_v51, %v3340_v50 }
  0xf4   :  { %2027 = vmatpush.bf16.msra.mxu0 %v3101_v58  ;;  %2041 = vmatpush.bf16.msra.mxu1 %v3165_v57  ;;  %v3110_v58 = vld [vmem:[#allocation8 + $0x28] sm:$0xf0] }
  0xf5   :  { %v3113_v6 = vor.u32 %v3606_v55, %v3110_v58  ;;  %2063 = vmatpush.bf16.msra.mxu3 %v3341_v52  ;;  %v3332_v55 = vld [vmem:[#allocation8 + $0x1e0] sm:$0xf]  ;;  %v3663_v58 = vld [vmem:[#allocation8 + $0x1e4] sm:$0xf0] }
  0xf8   :  { %2028 = vmatpush.bf16.msra.mxu0 %v3093_v4  ;;  %2042 = vmatpush.bf16.msra.mxu1 %v3157_v11  ;;  %v1404_v43 = vpop.f32.mrf.mxu0  ;;  %v1418_v46 = vpop.f32.mrf.mxu1  ;;  %v3643_v4 = vld [vmem:[#allocation8 + $0x144] sm:$0xf0] }
  0xf9   :  { %v1405_v53 = vadd.f32 %v1404_v43, %v1391_v42  ;;  %v3253_v8 = vor.u32 %v3643_v4, %v3252_v3  ;;  %v3635_v42 = vld [vmem:[#allocation8 + $0x104] sm:$0xf0]  ;;  %v3640_v3 = vld [vmem:[#allocation8 + $0x134] sm:$0xf]  ;;  %v3246_v4 = vld [vmem:[#allocation8 + $0x138] sm:$0xf0] }
  0xfa   :  { %v3221_v43 = vor.u32 %v3635_v42, %v3220_v41 }
  0xfb   :  { %2029 = vmatmul.bf16.vlgmr.msra.gmra.mxu0 %v3963_v17  ;;  %v1419_v57 = vadd.f32 %v1418_v46, %v1405_v53  ;;  %2052 = vmatpush.bf16.msra.mxu2 %v3253_v8  ;;  %v3644_v53 = vld [vmem:[#allocation8 + $0x154] sm:$0xf]  ;;  %v3659_v8 = vld [vmem:[#allocation8 + $0x1c4] sm:$0xf0] }
  0xfc   :  { %2077 = vmatpush.bf16.msrb.mxu0 %v3153_v9  ;;  %2091 = vmatpush.bf16.msrb.mxu1 %v3217_v14  ;;  %v3244_v9 = vld [vmem:[#allocation8 + $0x130] sm:$0xf]  ;;  %v3317_v12 = vor.u32 %v3659_v8, %v3316_v5  ;;  %v3310_v8 = vld [vmem:[#allocation8 + $0x1b8] sm:$0xf0] }
  0xfd   :  { %v3245_v15 = vor.u32 %v3641_v10, %v3244_v9  ;;  %v3638_v9 = vld [vmem:[#allocation8 + $0x124] sm:$0xf]  ;;  %v3238_v10 = vld [vmem:[#allocation8 + $0x128] sm:$0xf0] }
  0xff   :  { %2053 = vmatpush.bf16.msra.mxu2 %v3245_v15 }
 0x100   :  { %2078 = vmatpush.bf16.msrb.mxu0 %v3145_v19  ;;  %2092 = vmatpush.bf16.msrb.mxu1 %v3209_v22  ;;  %v1406_v0 = vpop.f32.mrf.mxu0  ;;  %v1446_v1 = vpop.f32.mrf.mxu3  ;;  %v3236_v19 = vld [vmem:[#allocation8 + $0x120] sm:$0xf]  ;;  %v3094_v22 = vld [vmem:[#allocation8 + $0x8] sm:$0xf0] }
 0x101   :  { %v1432_v63 = vpop.f32.mrf.mxu2  ;;  %v1407_v11 = vadd.f32 %v1406_v0, %v1393_v60  ;;  %v1420_v14 = vpop.f32.mrf.mxu1  ;;  %v3237_v23 = vor.u32 %v3639_v20, %v3236_v19  ;;  %v3097_v31 = vor.u32 %v3602_v21, %v3094_v22  ;;  %v3333_v60 = vor.u32 %v3663_v58, %v3332_v55  ;;  %v3230_v19 = vld [vmem:[#allocation8 + $0x118] sm:$0xf0] }
 0x102   :  { %v1433_v16 = vadd.f32 %v1432_v63, %v1419_v57  ;;  %v3254_v63 = vld [vmem:[#allocation8 + $0x148] sm:$0xf0]  ;;  %v317_v0 = vperm.slane %v3955_v56, 2 }
 0x103   :  { %v1421_v25 = vadd.f32 %v1420_v14, %v1407_v11  ;;  %2054 = vmatpush.bf16.msra.mxu2 %v3237_v23  ;;  %2064 = vmatpush.bf16.msra.mxu3 %v3333_v60  ;;  %v3257_v57 = vor.u32 %v3642_v62, %v3254_v63  ;;  %v3657_v14 = vld [vmem:[#allocation8 + $0x1b4] sm:$0xf0]  ;;  %v3660_v62 = vld [vmem:[#allocation8 + $0x1d4] sm:$0xf]  ;;  %v3326_v63 = vld [vmem:[#allocation8 + $0x1d8] sm:$0xf0] }
 0x104   :  { %2079 = vmatpush.bf16.msrb.mxu0 %v3137_v30  ;;  %2093 = vmatpush.bf16.msrb.mxu1 %v3201_v34  ;;  %v1447_v35 = vadd.f32 %v1446_v1, %v1433_v16  ;;  %v3324_v1 = vld [vmem:[#allocation8 + $0x1d0] sm:$0xf]  ;;  %v3241_v16 = vor.u32 %v3638_v9, %v3238_v10  ;;  %v3309_v21 = vor.u32 %v3657_v14, %v3308_v13  ;;  %v3654_v10 = vld [vmem:[#allocation8 + $0x1a4] sm:$0xf]  ;;  %v318_v13 = vperm.slane %v3955_v56, 3 }
 0x106   :  { %v1620_v37 = vmax.f32 %v1447_v35, 0.0 }
 0x107   :  { %2055 = vmatpush.bf16.msra.mxu2 %v3229_v36  ;;  %v3292_v36 = vld [vmem:[#allocation8 + $0x190] sm:$0xf] }
 0x108   :  { %2080 = vmatpush.bf16.msrb.mxu0 %v3129_v44  ;;  %2094 = vmatpush.bf16.msrb.mxu1 %v3193_v49  ;;  %v1448_v30 = vpop.f32.mrf.mxu3  ;;  %v3648_v44 = vld [vmem:[#allocation8 + $0x174] sm:$0xf]  ;;  %v3273_v49 = vor.u32 %v3646_v47, %v3270_v48 }
 0x109   :  { %v1434_v28 = vpop.f32.mrf.mxu2  ;;  %v3281_v46 = vor.u32 %v3648_v44, %v3278_v45  ;;  %v3284_v45 = vld [vmem:[#allocation8 + $0x180] sm:$0xf]  ;;  %v3664_v48 = vld [vmem:[#allocation8 + $0x1f4] sm:$0xf] }
 0x10a   :  { %v1435_v29 = vadd.f32 %v1434_v28, %v1421_v25  ;;  %v3300_v25 = vld [vmem:[#allocation8 + $0x1a0] sm:$0xf] }
 0x10b   :  { %2056 = vmatpush.bf16.msra.mxu2 %v3221_v43  ;;  %v3301_v35 = vor.u32 %v3655_v26, %v3300_v25 }
 0x10c   :  { %2081 = vmatpush.bf16.msrb.mxu0 %v3121_v54  ;;  %2095 = vmatpush.bf16.msrb.mxu1 %v3185_v59  ;;  %v1449_v34 = vadd.f32 %v1448_v30, %v1435_v29  ;;  %v3262_v54 = vld [vmem:[#allocation8 + $0x158] sm:$0xf0] }
 0x10e   :  { %v1624_v38 = vmax.f32 %v1449_v34, 0.0 }
 0x10f   :  { %2105 = vmatpush.bf16.msrb.mxu2 %v3281_v46  ;;  %v3651_v46 = vld [vmem:[#allocation8 + $0x184] sm:$0xf0] }
 0x110   :  { %2082 = vmatpush.bf16.msrb.mxu0 %v3113_v6  ;;  %2096 = vmatpush.bf16.msrb.mxu1 %v3177_v7  ;;  %v1628_v40 = vpack.c.bf16 %v1624_v38, %v1620_v37  ;;  %v3661_v6 = vld [vmem:[#allocation8 + $0x1d4] sm:$0xf0]  ;;  %v3249_v7 = vor.u32 %v3640_v3, %v3246_v4  ;;  %v3285_v47 = vor.u32 %v3651_v46, %v3284_v45  ;;  %v3672_v46 = vld [vmem:[#allocation10 + $0x30] sm:$0xff] }
 0x111   :  { %v3325_v2 = vor.u32 %v3661_v6, %v3324_v1  ;;  %v3653_v37 = vld [vmem:[#allocation8 + $0x194] sm:$0xf0]  ;;  %v3658_v6 = vld [vmem:[#allocation8 + $0x1c4] sm:$0xf] }
 0x112   :  { %2043 = vmatmul.bf16.vlgmr.msra.gmra.mxu1 %v1628_v40  ;;  %v3673_v45 = vld [vmem:[#allocation10 + $0x38] sm:$0xff] }
 0x113   :  { %2106 = vmatpush.bf16.msrb.mxu2 %v3273_v49  ;;  %2065 = vmatpush.bf16.msra.mxu3 %v3325_v2  ;;  %v3342_v49 = vld [vmem:[#allocation8 + $0x1f8] sm:$0xf0]  ;;  %v3318_v2 = vld [vmem:[#allocation8 + $0x1c8] sm:$0xf0] }
 0x114   :  { %2083 = vmatpush.bf16.msrb.mxu0 %v3105_v18  ;;  %2097 = vmatpush.bf16.msrb.mxu1 %v3169_v24  ;;  %v3636_v18 = vld [vmem:[#allocation8 + $0x114] sm:$0xf]  ;;  %v3345_v51 = vor.u32 %v3664_v48, %v3342_v49  ;;  %v3321_v3 = vor.u32 %v3658_v6, %v3318_v2  ;;  %v3670_v48 = vld [vmem:[#allocation10 + $0x20] sm:$0xff]  ;;  %v3669_v49 = vld [vmem:[#allocation10 + $0x18] sm:$0xff] }
 0x115   :  { %v3233_v28 = vor.u32 %v3636_v18, %v3230_v19  ;;  %v3650_v18 = vld [vmem:[#allocation8 + $0x184] sm:$0xf] }
 0x117   :  { %2066 = vmatpush.bf16.msra.mxu3 %v3317_v12 }
 0x118   :  { %2084 = vmatpush.bf16.msrb.mxu0 %v3097_v31  ;;  %2098 = vmatpush.bf16.msrb.mxu1 %v3161_v33  ;;  %v1460_v59 = vpop.f32.mrf.mxu0  ;;  %v1474_v61 = vpop.f32.mrf.mxu1  ;;  %v3634_v31 = vld [vmem:[#allocation8 + $0x104] sm:$0xf] }
 0x119   :  { %v1461_v11 = vadd.f32 %v1460_v59, %v317_v0  ;;  %v3225_v33 = vor.u32 %v3634_v31, %v3222_v39 }
 0x11b   :  { %2085 = vmatmul.bf16.vlgmr.msrb.gmra.mxu0 %v3963_v17  ;;  %v3265_v17 = vor.u32 %v3644_v53, %v3262_v54  ;;  %v1475_v22 = vadd.f32 %v1474_v61, %v1461_v11  ;;  %2067 = vmatpush.bf16.msra.mxu3 %v3309_v21  ;;  %v3662_v54 = vld [vmem:[#allocation8 + $0x1e4] sm:$0xf]  ;;  %v3302_v11 = vld [vmem:[#allocation8 + $0x1a8] sm:$0xf0] }
 0x11c   :  { %v3305_v12 = vor.u32 %v3654_v10, %v3302_v11  ;;  %2271 = vmatpush.bf16.msra.mxu0 %v3673_v45 }
 0x11d   :  { %2107 = vmatpush.bf16.msrb.mxu2 %v3265_v17  ;;  %v3334_v17 = vld [vmem:[#allocation8 + $0x1e8] sm:$0xf0] }
 0x11e   :  { %v3337_v59 = vor.u32 %v3662_v54, %v3334_v17  ;;  %v3679_v54 = vld [vmem:[#allocation10 + $0x68] sm:$0xff]  ;;  %v3666_v17 = vld [vmem:[#allocation10] sm:$0xff] }
 0x11f   :  { %2068 = vmatpush.bf16.msra.mxu3 %v3301_v35 }
 0x120   :  { %v1462_v20 = vpop.f32.mrf.mxu0  ;;  %v1476_v24 = vpop.f32.mrf.mxu1  ;;  %2272 = vmatpush.bf16.msra.mxu0 %v3672_v46 }
 0x121   :  { %2108 = vmatpush.bf16.msrb.mxu2 %v3257_v57  ;;  %v1488_v15 = vpop.f32.mrf.mxu2  ;;  %v1502_v27 = vpop.f32.mrf.mxu3  ;;  %v1463_v23 = vadd.f32 %v1462_v20, %v317_v0  ;;  %v3329_v0 = vor.u32 %v3660_v62, %v3326_v63  ;;  %v3675_v63 = vld [vmem:[#allocation10 + $0x48] sm:$0xff] }
 0x122   :  { %2099 = vmatmul.bf16.vlgmr.msrb.gmra.mxu1 %v1628_v40  ;;  %v1489_v29 = vadd.f32 %v1488_v15, %v1475_v22  ;;  %v3293_v40 = vor.u32 %v3653_v37, %v3292_v36  ;;  %v3652_v15 = vld [vmem:[#allocation8 + $0x194] sm:$0xf] }
 0x123   :  { %v1477_v30 = vadd.f32 %v1476_v24, %v1463_v23  ;;  %v3286_v24 = vld [vmem:[#allocation8 + $0x188] sm:$0xf0] }
 0x124   :  { %v1503_v34 = vadd.f32 %v1502_v27, %v1489_v29  ;;  %2069 = vmatpush.bf16.msra.mxu3 %v3293_v40  ;;  %v3289_v25 = vor.u32 %v3650_v18, %v3286_v24 }
 0x125   :  { %2109 = vmatpush.bf16.msrb.mxu2 %v3249_v7  ;;  %v3656_v7 = vld [vmem:[#allocation8 + $0x1b4] sm:$0xf] }
 0x126   :  { %v3313_v9 = vor.u32 %v3656_v7, %v3310_v8 }
 0x128   :  { %2070 = vmatpush.bf16.msra.mxu3 %v3285_v47  ;;  %v3671_v47 = vld [vmem:[#allocation10 + $0x28] sm:$0xff] }
 0x129   :  { %2110 = vmatpush.bf16.msrb.mxu2 %v3241_v16  ;;  %v1490_v32 = vpop.f32.mrf.mxu2  ;;  %v1504_v43 = vpop.f32.mrf.mxu3  ;;  %v3294_v16 = vld [vmem:[#allocation8 + $0x198] sm:$0xf0]  ;;  %2273 = vmatpush.bf16.msra.mxu0 %v3671_v47 }
 0x12a   :  { %v1491_v42 = vadd.f32 %v1490_v32, %v1477_v30  ;;  %v3297_v22 = vor.u32 %v3652_v15, %v3294_v16 }
 0x12c   :  { %v1505_v50 = vadd.f32 %v1504_v43, %v1491_v42  ;;  %2119 = vmatpush.bf16.msrb.mxu3 %v3345_v51  ;;  %v3668_v51 = vld [vmem:[#allocation10 + $0x10] sm:$0xff] }
 0x12d   :  { %2111 = vmatpush.bf16.msrb.mxu2 %v3233_v28  ;;  %2274 = vmatpush.bf16.msra.mxu0 %v3670_v48 }
 0x130   :  { %2120 = vmatpush.bf16.msrb.mxu3 %v3337_v59  ;;  %v3676_v59 = vld [vmem:[#allocation10 + $0x50] sm:$0xff] }
 0x131   :  { %2112 = vmatpush.bf16.msrb.mxu2 %v3225_v33  ;;  %2275 = vmatpush.bf16.msra.mxu0 %v3669_v49 }
 0x134   :  { %2121 = vmatpush.bf16.msrb.mxu3 %v3329_v0  ;;  %v3674_v0 = vld [vmem:[#allocation10 + $0x40] sm:$0xff] }
 0x135   :  { %2276 = vmatpush.bf16.msra.mxu0 %v3668_v51 }
 0x138   :  { %v1516_v38 = vpop.f32.mrf.mxu0  ;;  %v1530_v41 = vpop.f32.mrf.mxu1  ;;  %2122 = vmatpush.bf16.msrb.mxu3 %v3321_v3 }
 0x139   :  { %v1517_v44 = vadd.f32 %v1516_v38, %v1503_v34 }
 0x13b   :  { %v1531_v52 = vadd.f32 %v1530_v41, %v1517_v44 }
 0x13c   :  { %2123 = vmatpush.bf16.msrb.mxu3 %v3313_v9 }
 0x13d   :  { %v1621_v60 = vmax.f32 %v1531_v52, 0.0  ;;  %v3680_v52 = vld [vmem:[#allocation10 + $0x70] sm:$0xff] }
 0x140   :  { %v1518_v53 = vpop.f32.mrf.mxu0  ;;  %v1532_v58 = vpop.f32.mrf.mxu1  ;;  %2124 = vmatpush.bf16.msrb.mxu3 %v3305_v12 }
 0x141   :  { %v1519_v55 = vadd.f32 %v1518_v53, %v1505_v50  ;;  %v1544_v4 = vpop.f32.mrf.mxu2  ;;  %v1558_v5 = vpop.f32.mrf.mxu3  ;;  %v3681_v50 = vld [vmem:[#allocation10 + $0x78] sm:$0xff]  ;;  %v3667_v53 = vld [vmem:[#allocation10 + $0x8] sm:$0xff] }
 0x142   :  { %v1545_v19 = vadd.f32 %v1544_v4, %v318_v13  ;;  %2285 = vmatpush.bf16.msra.mxu1 %v3681_v50  ;;  %2277 = vmatpush.bf16.msra.mxu0 %v3667_v53 }
 0x143   :  { %v1533_v61 = vadd.f32 %v1532_v58, %v1519_v55  ;;  %v3678_v55 = vld [vmem:[#allocation10 + $0x60] sm:$0xff]  ;;  %v3677_v58 = vld [vmem:[#allocation10 + $0x58] sm:$0xff] }
 0x144   :  { %2125 = vmatpush.bf16.msrb.mxu3 %v3297_v22  ;;  %v1559_v27 = vadd.f32 %v1558_v5, %v1545_v19 }
 0x145   :  { %v1625_v57 = vmax.f32 %v1533_v61, 0.0 }
 0x146   :  { %2286 = vmatpush.bf16.msra.mxu1 %v3680_v52  ;;  %2278 = vmatpush.bf16.msra.mxu0 %v3666_v17 }
 0x147   :  { %v1629_v1 = vpack.c.bf16 %v1625_v57, %v1621_v60  ;;  %v1695_v57 = vld [vmem:[%s3986_s4] sm:$0x3] }
 0x148   :  { %2126 = vmatpush.bf16.msrb.mxu3 %v3289_v25 }
 0x149   :  { %2057 = vmatmul.bf16.vlgmr.msra.gmra.mxu2 %v1629_v1  ;;  %v1546_v14 = vpop.f32.mrf.mxu2  ;;  %v1560_v20 = vpop.f32.mrf.mxu3 }
 0x14a   :  { %v1547_v28 = vadd.f32 %v1546_v14, %v318_v13  ;;  %2287 = vmatpush.bf16.msra.mxu1 %v3679_v54 }
 0x14c   :  { %v1561_v56 = vadd.f32 %v1560_v20, %v1547_v28 }
 0x14e   :  { %2288 = vmatpush.bf16.msra.mxu1 %v3678_v55 }
 0x152   :  { %2289 = vmatpush.bf16.msra.mxu1 %v3677_v58 }
 0x156   :  { %2290 = vmatpush.bf16.msra.mxu1 %v3676_v59 }
 0x158   :  { %v1572_v21 = vpop.f32.mrf.mxu0  ;;  %v1586_v26 = vpop.f32.mrf.mxu1 }
 0x159   :  { %2113 = vmatmul.bf16.vlgmr.msrb.gmra.mxu2 %v1629_v1  ;;  %v1573_v23 = vadd.f32 %v1572_v21, %v1559_v27  ;;  %v1697_v1 = vperm.slane %v1695_v57, 0  ;;  %v1698_v21 = vperm.slane %v1695_v57, 1 }
 0x15a   :  { %2291 = vmatpush.bf16.msra.mxu1 %v3675_v63 }
 0x15b   :  { %v1587_v31 = vadd.f32 %v1586_v26, %v1573_v23 }
 0x15e   :  { %2292 = vmatpush.bf16.msra.mxu1 %v3674_v0 }
 0x160   :  { %v1600_v35 = vpop.f32.mrf.mxu2  ;;  %v1614_v29 = vpop.f32.mrf.mxu3 }
 0x161   :  { %v1574_v30 = vpop.f32.mrf.mxu0  ;;  %v1601_v32 = vadd.f32 %v1600_v35, %v1587_v31  ;;  %v1588_v33 = vpop.f32.mrf.mxu1 }
 0x162   :  { %v1575_v39 = vadd.f32 %v1574_v30, %v1561_v56 }
 0x163   :  { %v1615_v37 = vadd.f32 %v1614_v29, %v1601_v32 }
 0x164   :  { %v1589_v34 = vadd.f32 %v1588_v33, %v1575_v39 }
 0x165   :  { %v1622_v42 = vmax.f32 %v1615_v37, 0.0 }
 0x168   :  { %v1602_v36 = vpop.f32.mrf.mxu2  ;;  %v1616_v40 = vpop.f32.mrf.mxu3 }
 0x169   :  { %v1603_v38 = vadd.f32 %v1602_v36, %v1589_v34 }
 0x16b   :  { %v1617_v41 = vadd.f32 %v1616_v40, %v1603_v38  ;;  %v3696_v38 = vld [vmem:[%s3988_s6] ss:$0 sm:$0xff] }
 0x16d   :  { %v1626_v43 = vmax.f32 %v1617_v41, 0.0 }
 0x16f   :  { %v1630_v44 = vpack.c.bf16 %v1626_v43, %v1622_v42 }
 0x171   :  { %2071 = vmatmul.bf16.vlgmr.msra.gmra.mxu3 %v1630_v44 }
 0x178   :  { %v2030_v60 = vpop.f32.mrf.mxu0 }
 0x179   :  { %v2031_v5 = vadd.f32 %v2030_v60, %v1697_v1 }
 0x180   :  { %v2032_v6 = vpop.f32.mrf.mxu0 }
 0x181   :  { %2127 = vmatmul.bf16.vlgmr.msrb.gmra.mxu3 %v1630_v44  ;;  %v2033_v7 = vadd.f32 %v2032_v6, %v1697_v1 }
 0x18f   :  { %v2044_v61 = vpop.f32.mrf.mxu1 }
 0x190   :  { %v2045_v8 = vadd.f32 %v2044_v61, %v2031_v5 }
 0x197   :  { %v2046_v2 = vpop.f32.mrf.mxu1 }
 0x198   :  { %v2047_v9 = vadd.f32 %v2046_v2, %v2033_v7  ;;  %v2086_v11 = vpop.f32.mrf.mxu0 }
 0x199   :  { %v2087_v26 = vadd.f32 %v2086_v11, %v1698_v21 }
 0x19f   :  { %v2100_v14 = vpop.f32.mrf.mxu1 }
 0x1a0   :  { %v2088_v24 = vpop.f32.mrf.mxu0  ;;  %v2101_v23 = vadd.f32 %v2100_v14, %v2087_v26 }
 0x1a1   :  { %v2089_v28 = vadd.f32 %v2088_v24, %v1698_v21 }
 0x1a7   :  { %v2102_v27 = vpop.f32.mrf.mxu1 }
 0x1a8   :  { %v2103_v56 = vadd.f32 %v2102_v27, %v2089_v28 }
 0x1cc   :  { %v2058_v62 = vpop.f32.mrf.mxu2 }
 0x1cd   :  { %v2059_v10 = vadd.f32 %v2058_v62, %v2045_v8 }
 0x1d4   :  { %v2060_v3 = vpop.f32.mrf.mxu2 }
 0x1d5   :  { %v2061_v12 = vadd.f32 %v2060_v3, %v2047_v9 }
 0x1dc   :  { %v2114_v18 = vpop.f32.mrf.mxu2 }
 0x1dd   :  { %v2115_v29 = vadd.f32 %v2114_v18, %v2101_v23 }
 0x1e4   :  { %v2116_v35 = vpop.f32.mrf.mxu2 }
 0x1e5   :  { %v2117_v30 = vadd.f32 %v2116_v35, %v2103_v56 }
 0x1f4   :  { %v2072_v4 = vpop.f32.mrf.mxu3 }
 0x1f5   :  { %v2073_v13 = vadd.f32 %v2072_v4, %v2059_v10 }
 0x1f7   :  { %v2133_v19 = vmax.f32 %v2073_v13, 0.0 }
 0x1fc   :  { %v2074_v15 = vpop.f32.mrf.mxu3 }
 0x1fd   :  { %v2075_v16 = vadd.f32 %v2074_v15, %v2061_v12 }
 0x1ff   :  { %v2135_v20 = vmax.f32 %v2075_v16, 0.0 }
 0x201   :  { %v2137_v22 = vpack.c.bf16 %v2135_v20, %v2133_v19 }
 0x203   :  { %2279 = vmatmul.bf16.vlgmr.msra.gmra.mxu0 %v2137_v22 }
 0x204   :  { %v2128_v25 = vpop.f32.mrf.mxu3 }
 0x205   :  { %v2129_v31 = vadd.f32 %v2128_v25, %v2115_v29 }
 0x207   :  { %v2134_v33 = vmax.f32 %v2129_v31, 0.0 }
 0x20c   :  { %v2130_v39 = vpop.f32.mrf.mxu3 }
 0x20d   :  { %v2131_v32 = vadd.f32 %v2130_v39, %v2117_v30 }
 0x20f   :  { %v2136_v34 = vmax.f32 %v2131_v32, 0.0 }
 0x211   :  { %v2138_v36 = vpack.c.bf16 %v2136_v34, %v2134_v33 }
 0x213   :  { %2293 = vmatmul.bf16.vlgmr.msra.gmra.mxu1 %v2138_v36 }
 0x280   :  { %v2280_v37 = vpop.f32.mrf.mxu0 }
 0x281   :  { %v2281_v40 = vadd.f32 %v3696_v38, %v2280_v37 }
 0x288   :  { %v2282_v43 = vpop.f32.mrf.mxu0 }
 0x289   :  { %v2283_v44 = vadd.f32 %v3696_v38, %v2282_v43 }
 0x290   :  { %v2294_v41 = vpop.f32.mrf.mxu1 }
 0x291   :  { %v2295_v42 = vadd.f32 %v2294_v41, %v2281_v40 }
 0x293   :  { %2299 = vst [vmem:[#allocation11] sm:$0xff] %v2295_v42 }
 0x298   :  { %v2296_v45 = vpop.f32.mrf.mxu1 }
 0x299   :  { %v2297_v46 = vadd.f32 %v2296_v45, %v2283_v44 }
 0x29b   :  { %2300 = vst [vmem:[#allocation11 + $0x8] sm:$0xff] %v2297_v46 }
 0x29c   :  { %2313 = dma.vmem_to_hbm [thread:$0]  %s2306_s10, 256, %s2308_s1, [#allocation4], %s3853_s13, %s3853_s13, %s3854_s14  }
 0x29d   :  { %3847 = dma.done.wait [#allocation4], 256  }
 0x29e   :  { %3848 = vsyncadd [#allocation4], 4294967040 }
 0x29f   :  { %2318 = vsyncpa [#allocation3], 1 }
 0x2a0   :  { %2319 = vsyncpa [#allocation6], 1 }
 0x2a1   :  { %2320 = vsyncpa [#allocation9], 1 }
 0x2a2   :  { %2321 = vsyncpa [#allocation4], 1 }

</bundles_post_ra>
